<compile_context>
chip_gen: v7x
topology: tpu7x:2x2x1
jax: 0.10.0
libtpu: 0.0.40
codegen_flags: <defaults>
</compile_context>

<pallas_src>
import functools

import jax
import jax.numpy as jnp
from jax.experimental import pallas as pl
from jax.experimental.pallas import tpu as pltpu


# ----------------------------------------------------------------------------
# Kernel 1: three fused single-layer LSTMs (grid = (3,) over segments, parallel).
# ----------------------------------------------------------------------------
def _lstm3_kernel(lens_ref, x_ref, wih_ref, whh_ref, b_ref, out_ref, *, seq_len):
    s = pl.program_id(0)
    _, TB, _ = x_ref.shape
    T = seq_len
    B = TB // T
    H = whh_ref.shape[1]

    # Input projection hoisted out of the recurrence: one (T*B, E) @ (E, 4H)
    # matmul + bias for the whole segment.  Rows are time-major (row = t*B + b).
    gx = (jnp.dot(x_ref[0], wih_ref[0], preferred_element_type=jnp.float32)
          + b_ref[0])                                    # (T*B, 4H)
    whh = whh_ref[0]                                     # (H, 4H), loaded once

    h = jnp.zeros((B, H), jnp.float32)
    c = jnp.zeros((B, H), jnp.float32)
    hs = []
    # T is small and static -> fully unrolled recurrence (static indices only).
    for t in range(T):
        g = gx[t * B:(t + 1) * B] + jnp.dot(
            h, whh, preferred_element_type=jnp.float32)  # (B, 4H)
        i = jax.nn.sigmoid(g[:, 0 * H:1 * H])
        f = jax.nn.sigmoid(g[:, 1 * H:2 * H])
        gg = jnp.tanh(g[:, 2 * H:3 * H])
        o = jax.nn.sigmoid(g[:, 3 * H:4 * H])
        c = f * c + i * gg
        h = o * jnp.tanh(c)
        hs.append(h)

    # Write the memory batch-major flat (row = b*T + t), zeroing steps past the
    # sequence length (DynamicLSTM pack/unpack pads with zeros).  One aligned
    # (T, H) VMEM store per batch element; one HBM writeback per segment.
    t_iota = jax.lax.broadcasted_iota(jnp.int32, (T, H), 0)
    for b in range(B):
        mem_b = jnp.concatenate([hs[t][b:b + 1] for t in range(T)], axis=0)  # (T, H)
        mask_b = (t_iota < lens_ref[s, b]).astype(jnp.float32)
        out_ref[0, b * T:(b + 1) * T] = mem_b * mask_b


def lstm3(x_flat, lens, w_ih, w_hh, b, *, seq_len):
    """x_flat: [3, T*B, E] time-major-flat embeddings; lens: [3, B] int32.
    Returns memories [3, B*T, H] batch-major-flat (float32)."""
    S, TB, E = x_flat.shape
    H = w_hh.shape[1]
    return pl.pallas_call(
        functools.partial(_lstm3_kernel, seq_len=seq_len),
        out_shape=jax.ShapeDtypeStruct((S, TB, H), jnp.float32),
        grid_spec=pltpu.PrefetchScalarGridSpec(
            num_scalar_prefetch=1,        # lens -> SMEM
            grid=(S,),
            in_specs=[
                pl.BlockSpec((1, TB, E), lambda s, lens: (s, 0, 0)),
                pl.BlockSpec((1, E, 4 * H), lambda s, lens: (s, 0, 0)),
                pl.BlockSpec((1, H, 4 * H), lambda s, lens: (s, 0, 0)),
                pl.BlockSpec((1, 1, 4 * H), lambda s, lens: (s, 0, 0)),
            ],
            out_specs=pl.BlockSpec((1, TB, H), lambda s, lens: (s, 0, 0)),
        ),
        compiler_params=pltpu.CompilerParams(
            dimension_semantics=("parallel",)),
    )(lens, x_flat, w_ih, w_hh, b)


# ----------------------------------------------------------------------------
# Kernel 2: rotatory bi-linear attention + dense + softmax, whole batch at once.
# Attention heads stacked along axis 0: 0: t2c_l, 1: t2c_r, 2: c2t_l, 3: c2t_r.
# ----------------------------------------------------------------------------
def _rot_attn_kernel(mem_ref, inv_len_ref, wk_ref, bk_ref, wq_ref, bq_ref,
                     wb_ref, wp_ref, bp_ref, wd_ref, bd_ref, out_ref):
    BT = mem_ref.shape[1]
    H = mem_ref.shape[2]
    B = out_ref.shape[0]
    T = BT // B

    mem_l = mem_ref[0]          # (B*T, H), row = b*T + t
    mem_c = mem_ref[1]
    mem_r = mem_ref[2]

    # v_c[b] = mean over valid timesteps of center memory (padded rows are zero).
    vc_rows = [jnp.sum(mem_c[b * T:(b + 1) * T], axis=0, keepdims=True)
               for b in range(B)]
    v_c = jnp.concatenate(vc_rows, axis=0) * inv_len_ref[...]        # (B, H)

    def attn(a, mem_flat, q_bh):
        # Key projection for all (b, t) rows at once: M = B*T matmul.
        kx = (jnp.dot(mem_flat, wk_ref[a], preferred_element_type=jnp.float32)
              + bk_ref[a])                                            # (B*T, H)
        # Query-side projections batched over B.
        qx = (jnp.dot(q_bh, wq_ref[a], preferred_element_type=jnp.float32)
              + bq_ref[a])                                            # (B, H)
        qw = jnp.dot(qx, wb_ref[a], preferred_element_type=jnp.float32)  # (B, H)
        outs = []
        for b in range(B):
            kx_b = kx[b * T:(b + 1) * T]                              # (T, H) view
            # Bi-linear score, contracted on H (no materialized k^T).
            sc = jnp.sum(qw[b:b + 1] * kx_b, axis=-1, keepdims=True)  # (T, 1)
            sc = sc - jnp.max(sc, axis=0, keepdims=True)
            e = jnp.exp(sc)
            w = e / jnp.sum(e, axis=0, keepdims=True)                 # softmax over T
            outs.append(jnp.sum(w * kx_b, axis=0, keepdims=True))     # (1, H)
        o = jnp.concatenate(outs, axis=0)                             # (B, H)
        return (jnp.dot(o, wp_ref[a], preferred_element_type=jnp.float32)
                + bp_ref[a])                                          # (B, H)

    v_l = attn(0, mem_l, v_c)            # target-to-context left
    v_r = attn(1, mem_r, v_c)            # target-to-context right
    v_c_l = attn(2, mem_c, v_l)          # context-to-target left
    v_c_r = attn(3, mem_c, v_r)          # context-to-target right

    v_s = jnp.concatenate([v_l, v_c_l, v_c_r, v_r], axis=-1)          # (B, 4H)
    logits = (jnp.dot(v_s, wd_ref[...], preferred_element_type=jnp.float32)
              + bd_ref[...])
    out_ref[...] = jax.nn.softmax(logits, axis=-1)                    # (B, P)


def rotatory_attention(mem, inv_len_c, attn_p, wd, bd):
    """mem: [3, B*T, H] batch-major-flat memories; inv_len_c: [B, 1]."""
    B = inv_len_c.shape[0]
    P = wd.shape[-1]
    return pl.pallas_call(
        _rot_attn_kernel,
        out_shape=jax.ShapeDtypeStruct((B, P), jnp.float32),
    )(mem, inv_len_c,
      attn_p["wk"], attn_p["bk"], attn_p["wq"], attn_p["bq"],
      attn_p["wb"], attn_p["wp"], attn_p["bp"], wd, bd)


# ----------------------------------------------------------------------------
# Parameter init (deterministic, synthetic) and full forward (glue in JAX).
# ----------------------------------------------------------------------------
def init_params(key, vocab, E, H, P):
    keys = iter(jax.random.split(key, 32))
    nrm = lambda shape, s=0.1: jax.random.normal(next(keys), shape, jnp.float32) * s

    embed = nrm((vocab, E), 0.5).at[0].set(0.0)   # row 0 = padding

    attn_p = dict(
        wk=nrm((4, H, H)), bk=jnp.zeros((4, 1, H), jnp.float32),
        wq=nrm((4, H, H)), bq=jnp.zeros((4, 1, H), jnp.float32),
        wb=nrm((4, H, H)),
        wp=nrm((4, H, H)), bp=jnp.zeros((4, 1, H), jnp.float32),
    )
    return dict(
        embed=embed,
        # LSTM weights for the 3 segments stacked on axis 0 (l, c, r).
        w_ih=nrm((3, E, 4 * H)),
        w_hh=nrm((3, H, 4 * H)),
        b=jnp.zeros((3, 1, 4 * H), jnp.float32),   # bias: 0 (per spec)
        attn=attn_p,
        wd=nrm((4 * H, P)), bd=jnp.zeros((1, P), jnp.float32))


@jax.jit
def lcrs_forward(params, x_l, x_c, x_r):
    B, T = x_l.shape
    ids = jnp.stack([x_l, x_c, x_r], axis=0)                     # (3, B, T)
    lens = jnp.sum(ids != 0, axis=-1).astype(jnp.int32)          # (3, B)

    # Time-major-flat embeddings: transpose the tiny int token array (not the
    # big [T,B,E] embeddings) so the gather lands directly in [3, T*B, E].
    ids_tm = jnp.transpose(ids, (0, 2, 1)).reshape(3, T * B)     # row = t*B + b
    x_flat = params["embed"][ids_tm]                             # (3, T*B, E)

    mem = lstm3(x_flat, lens, params["w_ih"], params["w_hh"], params["b"],
                seq_len=T)                                       # (3, B*T, H)

    # TODO(synk): assumes all segment lengths > 0; the reference's batch-size-1
    # `len == 0 -> memory = embedding` fallback is not modeled.
    inv_len_c = (1.0 / lens[1].astype(jnp.float32))[:, None]     # (B, 1)
    return rotatory_attention(mem, inv_len_c, params["attn"],
                              params["wd"], params["bd"])        # (B, P)


if __name__ == "__main__":
    B, T, E, H, P, V = 2, 8, 32, 32, 3, 50

    key = jax.random.PRNGKey(0)
    kp, kl, kc, kr = jax.random.split(key, 4)
    params = init_params(kp, V, E, H, P)

    def make_tokens(k, seq_lens):
        toks = jax.random.randint(k, (B, T), 1, V, dtype=jnp.int32)
        m = jnp.arange(T)[None, :] < jnp.array(seq_lens)[:, None]
        return jnp.where(m, toks, 0)

    # Keep at least one full-length sequence per segment so max(len) == T,
    # matching DynamicLSTM's re-pad-to-max behaviour exactly.
    x_l = make_tokens(kl, [6, 8])
    x_c = make_tokens(kc, [3, 8])
    x_r = make_tokens(kr, [8, 5])

    out = jax.block_until_ready(lcrs_forward(params, x_l, x_c, x_r))

    assert out.shape == (B, P), out.shape
    assert jnp.allclose(jnp.sum(out, axis=-1), 1.0, atol=1e-4)
    print("KERNEL_OK")
</pallas_src>

<mosaic_0001>
module attributes {stable_mosaic.version = 11 : i64} {
  func.func @_lstm3_kernel(%arg0: i32, %arg1: memref<3x2xi32, #tpu.memory_space<smem>>, %arg2: memref<1x16x32xf32, #tpu.memory_space<vmem>>, %arg3: memref<1x32x128xf32, #tpu.memory_space<vmem>>, %arg4: memref<1x32x128xf32, #tpu.memory_space<vmem>>, %arg5: memref<1x1x128xf32, #tpu.memory_space<vmem>>, %arg6: memref<1x16x32xf32, #tpu.memory_space<vmem>>) attributes {dimension_semantics = [#tpu.dimension_semantics<parallel>], iteration_bounds = array<i64: 3>, scalar_prefetch = 1 : i64, scratch_operands = 0 : i64, tpu.core_type = #tpu.core_type<tc>, window_params = [{transform_indices = @transform_0, window_bounds = array<i64: 1, 16, 32>}, {transform_indices = @transform_1, window_bounds = array<i64: 1, 32, 128>}, {transform_indices = @transform_2, window_bounds = array<i64: 1, 32, 128>}, {transform_indices = @transform_3, window_bounds = array<i64: 1, 1, 128>}, {transform_indices = @transform_4, window_bounds = array<i64: 1, 16, 32>}]} {
    %c0 = arith.constant 0 : index
    %c0_0 = arith.constant 0 : index
    %c0_1 = arith.constant 0 : index
    %0 = vector.load %arg2[%c0, %c0_0, %c0_1] : memref<1x16x32xf32, #tpu.memory_space<vmem>>, vector<1x16x32xf32>
    %1 = vector.shape_cast %0 : vector<1x16x32xf32> to vector<16x32xf32>
    %c0_2 = arith.constant 0 : index
    %c0_3 = arith.constant 0 : index
    %c0_4 = arith.constant 0 : index
    %2 = vector.load %arg3[%c0_2, %c0_3, %c0_4] : memref<1x32x128xf32, #tpu.memory_space<vmem>>, vector<1x32x128xf32>
    %3 = vector.shape_cast %2 : vector<1x32x128xf32> to vector<32x128xf32>
    %cst = arith.constant dense<0.000000e+00> : vector<16x128xf32>
    %4 = tpu.matmul %1, %3, %cst {dimension_numbers = #tpu.dot_dimension_numbers<[1], [0], [0], [1], [0, 0, 1, 1], [], []>} : vector<16x32xf32>, vector<32x128xf32>, vector<16x128xf32> -> vector<16x128xf32>
    %c0_5 = arith.constant 0 : index
    %c0_6 = arith.constant 0 : index
    %c0_7 = arith.constant 0 : index
    %5 = vector.load %arg5[%c0_5, %c0_6, %c0_7] : memref<1x1x128xf32, #tpu.memory_space<vmem>>, vector<1x1x128xf32>
    %6 = vector.shape_cast %5 : vector<1x1x128xf32> to vector<1x128xf32>
    %7 = vector.broadcast %6 : vector<1x128xf32> to vector<16x128xf32>
    %8 = arith.addf %4, %7 : vector<16x128xf32>
    %c0_8 = arith.constant 0 : index
    %c0_9 = arith.constant 0 : index
    %c0_10 = arith.constant 0 : index
    %9 = vector.load %arg4[%c0_8, %c0_9, %c0_10] : memref<1x32x128xf32, #tpu.memory_space<vmem>>, vector<1x32x128xf32>
    %10 = vector.shape_cast %9 : vector<1x32x128xf32> to vector<32x128xf32>
    %cst_11 = arith.constant 0.000000e+00 : f32
    %11 = vector.broadcast %cst_11 : f32 to vector<2x32xf32>
    %cst_12 = arith.constant 0.000000e+00 : f32
    %12 = vector.broadcast %cst_12 : f32 to vector<2x32xf32>
    %13 = vector.extract_strided_slice %8 {offsets = [0, 0], sizes = [2, 128], strides = [1, 1]} : vector<16x128xf32> to vector<2x128xf32>
    %cst_13 = arith.constant dense<0.000000e+00> : vector<2x128xf32>
    %14 = tpu.matmul %11, %10, %cst_13 {dimension_numbers = #tpu.dot_dimension_numbers<[1], [0], [0], [1], [0, 0, 1, 1], [], []>} : vector<2x32xf32>, vector<32x128xf32>, vector<2x128xf32> -> vector<2x128xf32>
    %15 = arith.addf %13, %14 : vector<2x128xf32>
    %16 = vector.extract_strided_slice %15 {offsets = [0, 0], sizes = [2, 32], strides = [1, 1]} : vector<2x128xf32> to vector<2x32xf32>
    %17 = arith.negf %16 : vector<2x32xf32>
    %18 = math.exp %17 : vector<2x32xf32>
    %cst_14 = arith.constant 1.000000e+00 : f32
    %19 = vector.broadcast %cst_14 : f32 to vector<2x32xf32>
    %20 = arith.addf %19, %18 : vector<2x32xf32>
    %21 = arith.divf %19, %20 : vector<2x32xf32>
    %22 = vector.extract_strided_slice %15 {offsets = [0, 32], sizes = [2, 32], strides = [1, 1]} : vector<2x128xf32> to vector<2x32xf32>
    %23 = arith.negf %22 : vector<2x32xf32>
    %24 = math.exp %23 : vector<2x32xf32>
    %cst_15 = arith.constant 1.000000e+00 : f32
    %25 = vector.broadcast %cst_15 : f32 to vector<2x32xf32>
    %26 = arith.addf %25, %24 : vector<2x32xf32>
    %27 = arith.divf %25, %26 : vector<2x32xf32>
    %28 = vector.extract_strided_slice %15 {offsets = [0, 64], sizes = [2, 32], strides = [1, 1]} : vector<2x128xf32> to vector<2x32xf32>
    %29 = math.tanh %28 : vector<2x32xf32>
    %30 = vector.extract_strided_slice %15 {offsets = [0, 96], sizes = [2, 32], strides = [1, 1]} : vector<2x128xf32> to vector<2x32xf32>
    %31 = arith.negf %30 : vector<2x32xf32>
    %32 = math.exp %31 : vector<2x32xf32>
    %cst_16 = arith.constant 1.000000e+00 : f32
    %33 = vector.broadcast %cst_16 : f32 to vector<2x32xf32>
    %34 = arith.addf %33, %32 : vector<2x32xf32>
    %35 = arith.divf %33, %34 : vector<2x32xf32>
    %36 = arith.mulf %27, %12 : vector<2x32xf32>
    %37 = arith.mulf %21, %29 : vector<2x32xf32>
    %38 = arith.addf %36, %37 : vector<2x32xf32>
    %39 = math.tanh %38 : vector<2x32xf32>
    %40 = arith.mulf %35, %39 : vector<2x32xf32>
    %41 = vector.extract_strided_slice %8 {offsets = [2, 0], sizes = [2, 128], strides = [1, 1]} : vector<16x128xf32> to vector<2x128xf32>
    %cst_17 = arith.constant dense<0.000000e+00> : vector<2x128xf32>
    %42 = tpu.matmul %40, %10, %cst_17 {dimension_numbers = #tpu.dot_dimension_numbers<[1], [0], [0], [1], [0, 0, 1, 1], [], []>} : vector<2x32xf32>, vector<32x128xf32>, vector<2x128xf32> -> vector<2x128xf32>
    %43 = arith.addf %41, %42 : vector<2x128xf32>
    %44 = vector.extract_strided_slice %43 {offsets = [0, 0], sizes = [2, 32], strides = [1, 1]} : vector<2x128xf32> to vector<2x32xf32>
    %45 = arith.negf %44 : vector<2x32xf32>
    %46 = math.exp %45 : vector<2x32xf32>
    %cst_18 = arith.constant 1.000000e+00 : f32
    %47 = vector.broadcast %cst_18 : f32 to vector<2x32xf32>
    %48 = arith.addf %47, %46 : vector<2x32xf32>
    %49 = arith.divf %47, %48 : vector<2x32xf32>
    %50 = vector.extract_strided_slice %43 {offsets = [0, 32], sizes = [2, 32], strides = [1, 1]} : vector<2x128xf32> to vector<2x32xf32>
    %51 = arith.negf %50 : vector<2x32xf32>
    %52 = math.exp %51 : vector<2x32xf32>
    %cst_19 = arith.constant 1.000000e+00 : f32
    %53 = vector.broadcast %cst_19 : f32 to vector<2x32xf32>
    %54 = arith.addf %53, %52 : vector<2x32xf32>
    %55 = arith.divf %53, %54 : vector<2x32xf32>
    %56 = vector.extract_strided_slice %43 {offsets = [0, 64], sizes = [2, 32], strides = [1, 1]} : vector<2x128xf32> to vector<2x32xf32>
    %57 = math.tanh %56 : vector<2x32xf32>
    %58 = vector.extract_strided_slice %43 {offsets = [0, 96], sizes = [2, 32], strides = [1, 1]} : vector<2x128xf32> to vector<2x32xf32>
    %59 = arith.negf %58 : vector<2x32xf32>
    %60 = math.exp %59 : vector<2x32xf32>
    %cst_20 = arith.constant 1.000000e+00 : f32
    %61 = vector.broadcast %cst_20 : f32 to vector<2x32xf32>
    %62 = arith.addf %61, %60 : vector<2x32xf32>
    %63 = arith.divf %61, %62 : vector<2x32xf32>
    %64 = arith.mulf %55, %38 : vector<2x32xf32>
    %65 = arith.mulf %49, %57 : vector<2x32xf32>
    %66 = arith.addf %64, %65 : vector<2x32xf32>
    %67 = math.tanh %66 : vector<2x32xf32>
    %68 = arith.mulf %63, %67 : vector<2x32xf32>
    %69 = vector.extract_strided_slice %8 {offsets = [4, 0], sizes = [2, 128], strides = [1, 1]} : vector<16x128xf32> to vector<2x128xf32>
    %cst_21 = arith.constant dense<0.000000e+00> : vector<2x128xf32>
    %70 = tpu.matmul %68, %10, %cst_21 {dimension_numbers = #tpu.dot_dimension_numbers<[1], [0], [0], [1], [0, 0, 1, 1], [], []>} : vector<2x32xf32>, vector<32x128xf32>, vector<2x128xf32> -> vector<2x128xf32>
    %71 = arith.addf %69, %70 : vector<2x128xf32>
    %72 = vector.extract_strided_slice %71 {offsets = [0, 0], sizes = [2, 32], strides = [1, 1]} : vector<2x128xf32> to vector<2x32xf32>
    %73 = arith.negf %72 : vector<2x32xf32>
    %74 = math.exp %73 : vector<2x32xf32>
    %cst_22 = arith.constant 1.000000e+00 : f32
    %75 = vector.broadcast %cst_22 : f32 to vector<2x32xf32>
    %76 = arith.addf %75, %74 : vector<2x32xf32>
    %77 = arith.divf %75, %76 : vector<2x32xf32>
    %78 = vector.extract_strided_slice %71 {offsets = [0, 32], sizes = [2, 32], strides = [1, 1]} : vector<2x128xf32> to vector<2x32xf32>
    %79 = arith.negf %78 : vector<2x32xf32>
    %80 = math.exp %79 : vector<2x32xf32>
    %cst_23 = arith.constant 1.000000e+00 : f32
    %81 = vector.broadcast %cst_23 : f32 to vector<2x32xf32>
    %82 = arith.addf %81, %80 : vector<2x32xf32>
    %83 = arith.divf %81, %82 : vector<2x32xf32>
    %84 = vector.extract_strided_slice %71 {offsets = [0, 64], sizes = [2, 32], strides = [1, 1]} : vector<2x128xf32> to vector<2x32xf32>
    %85 = math.tanh %84 : vector<2x32xf32>
    %86 = vector.extract_strided_slice %71 {offsets = [0, 96], sizes = [2, 32], strides = [1, 1]} : vector<2x128xf32> to vector<2x32xf32>
    %87 = arith.negf %86 : vector<2x32xf32>
    %88 = math.exp %87 : vector<2x32xf32>
    %cst_24 = arith.constant 1.000000e+00 : f32
    %89 = vector.broadcast %cst_24 : f32 to vector<2x32xf32>
    %90 = arith.addf %89, %88 : vector<2x32xf32>
    %91 = arith.divf %89, %90 : vector<2x32xf32>
    %92 = arith.mulf %83, %66 : vector<2x32xf32>
    %93 = arith.mulf %77, %85 : vector<2x32xf32>
    %94 = arith.addf %92, %93 : vector<2x32xf32>
    %95 = math.tanh %94 : vector<2x32xf32>
    %96 = arith.mulf %91, %95 : vector<2x32xf32>
    %97 = vector.extract_strided_slice %8 {offsets = [6, 0], sizes = [2, 128], strides = [1, 1]} : vector<16x128xf32> to vector<2x128xf32>
    %cst_25 = arith.constant dense<0.000000e+00> : vector<2x128xf32>
    %98 = tpu.matmul %96, %10, %cst_25 {dimension_numbers = #tpu.dot_dimension_numbers<[1], [0], [0], [1], [0, 0, 1, 1], [], []>} : vector<2x32xf32>, vector<32x128xf32>, vector<2x128xf32> -> vector<2x128xf32>
    %99 = arith.addf %97, %98 : vector<2x128xf32>
    %100 = vector.extract_strided_slice %99 {offsets = [0, 0], sizes = [2, 32], strides = [1, 1]} : vector<2x128xf32> to vector<2x32xf32>
    %101 = arith.negf %100 : vector<2x32xf32>
    %102 = math.exp %101 : vector<2x32xf32>
    %cst_26 = arith.constant 1.000000e+00 : f32
    %103 = vector.broadcast %cst_26 : f32 to vector<2x32xf32>
    %104 = arith.addf %103, %102 : vector<2x32xf32>
    %105 = arith.divf %103, %104 : vector<2x32xf32>
    %106 = vector.extract_strided_slice %99 {offsets = [0, 32], sizes = [2, 32], strides = [1, 1]} : vector<2x128xf32> to vector<2x32xf32>
    %107 = arith.negf %106 : vector<2x32xf32>
    %108 = math.exp %107 : vector<2x32xf32>
    %cst_27 = arith.constant 1.000000e+00 : f32
    %109 = vector.broadcast %cst_27 : f32 to vector<2x32xf32>
    %110 = arith.addf %109, %108 : vector<2x32xf32>
    %111 = arith.divf %109, %110 : vector<2x32xf32>
    %112 = vector.extract_strided_slice %99 {offsets = [0, 64], sizes = [2, 32], strides = [1, 1]} : vector<2x128xf32> to vector<2x32xf32>
    %113 = math.tanh %112 : vector<2x32xf32>
    %114 = vector.extract_strided_slice %99 {offsets = [0, 96], sizes = [2, 32], strides = [1, 1]} : vector<2x128xf32> to vector<2x32xf32>
    %115 = arith.negf %114 : vector<2x32xf32>
    %116 = math.exp %115 : vector<2x32xf32>
    %cst_28 = arith.constant 1.000000e+00 : f32
    %117 = vector.broadcast %cst_28 : f32 to vector<2x32xf32>
    %118 = arith.addf %117, %116 : vector<2x32xf32>
    %119 = arith.divf %117, %118 : vector<2x32xf32>
    %120 = arith.mulf %111, %94 : vector<2x32xf32>
    %121 = arith.mulf %105, %113 : vector<2x32xf32>
    %122 = arith.addf %120, %121 : vector<2x32xf32>
    %123 = math.tanh %122 : vector<2x32xf32>
    %124 = arith.mulf %119, %123 : vector<2x32xf32>
    %125 = vector.extract_strided_slice %8 {offsets = [8, 0], sizes = [2, 128], strides = [1, 1]} : vector<16x128xf32> to vector<2x128xf32>
    %cst_29 = arith.constant dense<0.000000e+00> : vector<2x128xf32>
    %126 = tpu.matmul %124, %10, %cst_29 {dimension_numbers = #tpu.dot_dimension_numbers<[1], [0], [0], [1], [0, 0, 1, 1], [], []>} : vector<2x32xf32>, vector<32x128xf32>, vector<2x128xf32> -> vector<2x128xf32>
    %127 = arith.addf %125, %126 : vector<2x128xf32>
    %128 = vector.extract_strided_slice %127 {offsets = [0, 0], sizes = [2, 32], strides = [1, 1]} : vector<2x128xf32> to vector<2x32xf32>
    %129 = arith.negf %128 : vector<2x32xf32>
    %130 = math.exp %129 : vector<2x32xf32>
    %cst_30 = arith.constant 1.000000e+00 : f32
    %131 = vector.broadcast %cst_30 : f32 to vector<2x32xf32>
    %132 = arith.addf %131, %130 : vector<2x32xf32>
    %133 = arith.divf %131, %132 : vector<2x32xf32>
    %134 = vector.extract_strided_slice %127 {offsets = [0, 32], sizes = [2, 32], strides = [1, 1]} : vector<2x128xf32> to vector<2x32xf32>
    %135 = arith.negf %134 : vector<2x32xf32>
    %136 = math.exp %135 : vector<2x32xf32>
    %cst_31 = arith.constant 1.000000e+00 : f32
    %137 = vector.broadcast %cst_31 : f32 to vector<2x32xf32>
    %138 = arith.addf %137, %136 : vector<2x32xf32>
    %139 = arith.divf %137, %138 : vector<2x32xf32>
    %140 = vector.extract_strided_slice %127 {offsets = [0, 64], sizes = [2, 32], strides = [1, 1]} : vector<2x128xf32> to vector<2x32xf32>
    %141 = math.tanh %140 : vector<2x32xf32>
    %142 = vector.extract_strided_slice %127 {offsets = [0, 96], sizes = [2, 32], strides = [1, 1]} : vector<2x128xf32> to vector<2x32xf32>
    %143 = arith.negf %142 : vector<2x32xf32>
    %144 = math.exp %143 : vector<2x32xf32>
    %cst_32 = arith.constant 1.000000e+00 : f32
    %145 = vector.broadcast %cst_32 : f32 to vector<2x32xf32>
    %146 = arith.addf %145, %144 : vector<2x32xf32>
    %147 = arith.divf %145, %146 : vector<2x32xf32>
    %148 = arith.mulf %139, %122 : vector<2x32xf32>
    %149 = arith.mulf %133, %141 : vector<2x32xf32>
    %150 = arith.addf %148, %149 : vector<2x32xf32>
    %151 = math.tanh %150 : vector<2x32xf32>
    %152 = arith.mulf %147, %151 : vector<2x32xf32>
    %153 = vector.extract_strided_slice %8 {offsets = [10, 0], sizes = [2, 128], strides = [1, 1]} : vector<16x128xf32> to vector<2x128xf32>
    %cst_33 = arith.constant dense<0.000000e+00> : vector<2x128xf32>
    %154 = tpu.matmul %152, %10, %cst_33 {dimension_numbers = #tpu.dot_dimension_numbers<[1], [0], [0], [1], [0, 0, 1, 1], [], []>} : vector<2x32xf32>, vector<32x128xf32>, vector<2x128xf32> -> vector<2x128xf32>
    %155 = arith.addf %153, %154 : vector<2x128xf32>
    %156 = vector.extract_strided_slice %155 {offsets = [0, 0], sizes = [2, 32], strides = [1, 1]} : vector<2x128xf32> to vector<2x32xf32>
    %157 = arith.negf %156 : vector<2x32xf32>
    %158 = math.exp %157 : vector<2x32xf32>
    %cst_34 = arith.constant 1.000000e+00 : f32
    %159 = vector.broadcast %cst_34 : f32 to vector<2x32xf32>
    %160 = arith.addf %159, %158 : vector<2x32xf32>
    %161 = arith.divf %159, %160 : vector<2x32xf32>
    %162 = vector.extract_strided_slice %155 {offsets = [0, 32], sizes = [2, 32], strides = [1, 1]} : vector<2x128xf32> to vector<2x32xf32>
    %163 = arith.negf %162 : vector<2x32xf32>
    %164 = math.exp %163 : vector<2x32xf32>
    %cst_35 = arith.constant 1.000000e+00 : f32
    %165 = vector.broadcast %cst_35 : f32 to vector<2x32xf32>
    %166 = arith.addf %165, %164 : vector<2x32xf32>
    %167 = arith.divf %165, %166 : vector<2x32xf32>
    %168 = vector.extract_strided_slice %155 {offsets = [0, 64], sizes = [2, 32], strides = [1, 1]} : vector<2x128xf32> to vector<2x32xf32>
    %169 = math.tanh %168 : vector<2x32xf32>
    %170 = vector.extract_strided_slice %155 {offsets = [0, 96], sizes = [2, 32], strides = [1, 1]} : vector<2x128xf32> to vector<2x32xf32>
    %171 = arith.negf %170 : vector<2x32xf32>
    %172 = math.exp %171 : vector<2x32xf32>
    %cst_36 = arith.constant 1.000000e+00 : f32
    %173 = vector.broadcast %cst_36 : f32 to vector<2x32xf32>
    %174 = arith.addf %173, %172 : vector<2x32xf32>
    %175 = arith.divf %173, %174 : vector<2x32xf32>
    %176 = arith.mulf %167, %150 : vector<2x32xf32>
    %177 = arith.mulf %161, %169 : vector<2x32xf32>
    %178 = arith.addf %176, %177 : vector<2x32xf32>
    %179 = math.tanh %178 : vector<2x32xf32>
    %180 = arith.mulf %175, %179 : vector<2x32xf32>
    %181 = vector.extract_strided_slice %8 {offsets = [12, 0], sizes = [2, 128], strides = [1, 1]} : vector<16x128xf32> to vector<2x128xf32>
    %cst_37 = arith.constant dense<0.000000e+00> : vector<2x128xf32>
    %182 = tpu.matmul %180, %10, %cst_37 {dimension_numbers = #tpu.dot_dimension_numbers<[1], [0], [0], [1], [0, 0, 1, 1], [], []>} : vector<2x32xf32>, vector<32x128xf32>, vector<2x128xf32> -> vector<2x128xf32>
    %183 = arith.addf %181, %182 : vector<2x128xf32>
    %184 = vector.extract_strided_slice %183 {offsets = [0, 0], sizes = [2, 32], strides = [1, 1]} : vector<2x128xf32> to vector<2x32xf32>
    %185 = arith.negf %184 : vector<2x32xf32>
    %186 = math.exp %185 : vector<2x32xf32>
    %cst_38 = arith.constant 1.000000e+00 : f32
    %187 = vector.broadcast %cst_38 : f32 to vector<2x32xf32>
    %188 = arith.addf %187, %186 : vector<2x32xf32>
    %189 = arith.divf %187, %188 : vector<2x32xf32>
    %190 = vector.extract_strided_slice %183 {offsets = [0, 32], sizes = [2, 32], strides = [1, 1]} : vector<2x128xf32> to vector<2x32xf32>
    %191 = arith.negf %190 : vector<2x32xf32>
    %192 = math.exp %191 : vector<2x32xf32>
    %cst_39 = arith.constant 1.000000e+00 : f32
    %193 = vector.broadcast %cst_39 : f32 to vector<2x32xf32>
    %194 = arith.addf %193, %192 : vector<2x32xf32>
    %195 = arith.divf %193, %194 : vector<2x32xf32>
    %196 = vector.extract_strided_slice %183 {offsets = [0, 64], sizes = [2, 32], strides = [1, 1]} : vector<2x128xf32> to vector<2x32xf32>
    %197 = math.tanh %196 : vector<2x32xf32>
    %198 = vector.extract_strided_slice %183 {offsets = [0, 96], sizes = [2, 32], strides = [1, 1]} : vector<2x128xf32> to vector<2x32xf32>
    %199 = arith.negf %198 : vector<2x32xf32>
    %200 = math.exp %199 : vector<2x32xf32>
    %cst_40 = arith.constant 1.000000e+00 : f32
    %201 = vector.broadcast %cst_40 : f32 to vector<2x32xf32>
    %202 = arith.addf %201, %200 : vector<2x32xf32>
    %203 = arith.divf %201, %202 : vector<2x32xf32>
    %204 = arith.mulf %195, %178 : vector<2x32xf32>
    %205 = arith.mulf %189, %197 : vector<2x32xf32>
    %206 = arith.addf %204, %205 : vector<2x32xf32>
    %207 = math.tanh %206 : vector<2x32xf32>
    %208 = arith.mulf %203, %207 : vector<2x32xf32>
    %209 = vector.extract_strided_slice %8 {offsets = [14, 0], sizes = [2, 128], strides = [1, 1]} : vector<16x128xf32> to vector<2x128xf32>
    %cst_41 = arith.constant dense<0.000000e+00> : vector<2x128xf32>
    %210 = tpu.matmul %208, %10, %cst_41 {dimension_numbers = #tpu.dot_dimension_numbers<[1], [0], [0], [1], [0, 0, 1, 1], [], []>} : vector<2x32xf32>, vector<32x128xf32>, vector<2x128xf32> -> vector<2x128xf32>
    %211 = arith.addf %209, %210 : vector<2x128xf32>
    %212 = vector.extract_strided_slice %211 {offsets = [0, 0], sizes = [2, 32], strides = [1, 1]} : vector<2x128xf32> to vector<2x32xf32>
    %213 = arith.negf %212 : vector<2x32xf32>
    %214 = math.exp %213 : vector<2x32xf32>
    %cst_42 = arith.constant 1.000000e+00 : f32
    %215 = vector.broadcast %cst_42 : f32 to vector<2x32xf32>
    %216 = arith.addf %215, %214 : vector<2x32xf32>
    %217 = arith.divf %215, %216 : vector<2x32xf32>
    %218 = vector.extract_strided_slice %211 {offsets = [0, 32], sizes = [2, 32], strides = [1, 1]} : vector<2x128xf32> to vector<2x32xf32>
    %219 = arith.negf %218 : vector<2x32xf32>
    %220 = math.exp %219 : vector<2x32xf32>
    %cst_43 = arith.constant 1.000000e+00 : f32
    %221 = vector.broadcast %cst_43 : f32 to vector<2x32xf32>
    %222 = arith.addf %221, %220 : vector<2x32xf32>
    %223 = arith.divf %221, %222 : vector<2x32xf32>
    %224 = vector.extract_strided_slice %211 {offsets = [0, 64], sizes = [2, 32], strides = [1, 1]} : vector<2x128xf32> to vector<2x32xf32>
    %225 = math.tanh %224 : vector<2x32xf32>
    %226 = vector.extract_strided_slice %211 {offsets = [0, 96], sizes = [2, 32], strides = [1, 1]} : vector<2x128xf32> to vector<2x32xf32>
    %227 = arith.negf %226 : vector<2x32xf32>
    %228 = math.exp %227 : vector<2x32xf32>
    %cst_44 = arith.constant 1.000000e+00 : f32
    %229 = vector.broadcast %cst_44 : f32 to vector<2x32xf32>
    %230 = arith.addf %229, %228 : vector<2x32xf32>
    %231 = arith.divf %229, %230 : vector<2x32xf32>
    %232 = arith.mulf %223, %206 : vector<2x32xf32>
    %233 = arith.mulf %217, %225 : vector<2x32xf32>
    %234 = arith.addf %232, %233 : vector<2x32xf32>
    %235 = math.tanh %234 : vector<2x32xf32>
    %236 = arith.mulf %231, %235 : vector<2x32xf32>
    %237 = tpu.iota {dimensions = array<i32: 0>} : vector<8x32xi32>
    %238 = vector.extract_strided_slice %40 {offsets = [0, 0], sizes = [1, 32], strides = [1, 1]} : vector<2x32xf32> to vector<1x32xf32>
    %239 = vector.extract_strided_slice %68 {offsets = [0, 0], sizes = [1, 32], strides = [1, 1]} : vector<2x32xf32> to vector<1x32xf32>
    %240 = vector.extract_strided_slice %96 {offsets = [0, 0], sizes = [1, 32], strides = [1, 1]} : vector<2x32xf32> to vector<1x32xf32>
    %241 = vector.extract_strided_slice %124 {offsets = [0, 0], sizes = [1, 32], strides = [1, 1]} : vector<2x32xf32> to vector<1x32xf32>
    %242 = vector.extract_strided_slice %152 {offsets = [0, 0], sizes = [1, 32], strides = [1, 1]} : vector<2x32xf32> to vector<1x32xf32>
    %243 = vector.extract_strided_slice %180 {offsets = [0, 0], sizes = [1, 32], strides = [1, 1]} : vector<2x32xf32> to vector<1x32xf32>
    %244 = vector.extract_strided_slice %208 {offsets = [0, 0], sizes = [1, 32], strides = [1, 1]} : vector<2x32xf32> to vector<1x32xf32>
    %245 = vector.extract_strided_slice %236 {offsets = [0, 0], sizes = [1, 32], strides = [1, 1]} : vector<2x32xf32> to vector<1x32xf32>
    %246 = tpu.concatenate %238, %239, %240, %241, %242, %243, %244, %245 in 0 : vector<1x32xf32>, vector<1x32xf32>, vector<1x32xf32>, vector<1x32xf32>, vector<1x32xf32>, vector<1x32xf32>, vector<1x32xf32>, vector<1x32xf32> -> vector<8x32xf32>
    %247 = arith.index_cast %arg0 : i32 to index
    %c0_45 = arith.constant 0 : index
    %248 = memref.load %arg1[%247, %c0_45] : memref<3x2xi32, #tpu.memory_space<smem>>
    %249 = vector.broadcast %248 : i32 to vector<8x32xi32>
    %250 = arith.cmpi slt, %237, %249 : vector<8x32xi32>
    %251 = arith.extui %250 : vector<8x32xi1> to vector<8x32xi32>
    %252 = arith.sitofp %251 : vector<8x32xi32> to vector<8x32xf32>
    %253 = arith.mulf %246, %252 : vector<8x32xf32>
    %c0_46 = arith.constant 0 : index
    %c0_47 = arith.constant 0 : index
    %c0_48 = arith.constant 0 : index
    %254 = vector.load %arg6[%c0_46, %c0_47, %c0_48] : memref<1x16x32xf32, #tpu.memory_space<vmem>>, vector<1x8x32xf32>
    %255 = vector.shape_cast %254 : vector<1x8x32xf32> to vector<8x32xf32>
    %256 = vector.shape_cast %253 : vector<8x32xf32> to vector<1x8x32xf32>
    tpu.vector_store %arg6[%c0_46, %c0_47, %c0_48], %256 {strides = array<i32>} : memref<1x16x32xf32, #tpu.memory_space<vmem>>, vector<1x8x32xf32>,
    %257 = vector.extract_strided_slice %40 {offsets = [1, 0], sizes = [1, 32], strides = [1, 1]} : vector<2x32xf32> to vector<1x32xf32>
    %258 = vector.extract_strided_slice %68 {offsets = [1, 0], sizes = [1, 32], strides = [1, 1]} : vector<2x32xf32> to vector<1x32xf32>
    %259 = vector.extract_strided_slice %96 {offsets = [1, 0], sizes = [1, 32], strides = [1, 1]} : vector<2x32xf32> to vector<1x32xf32>
    %260 = vector.extract_strided_slice %124 {offsets = [1, 0], sizes = [1, 32], strides = [1, 1]} : vector<2x32xf32> to vector<1x32xf32>
    %261 = vector.extract_strided_slice %152 {offsets = [1, 0], sizes = [1, 32], strides = [1, 1]} : vector<2x32xf32> to vector<1x32xf32>
    %262 = vector.extract_strided_slice %180 {offsets = [1, 0], sizes = [1, 32], strides = [1, 1]} : vector<2x32xf32> to vector<1x32xf32>
    %263 = vector.extract_strided_slice %208 {offsets = [1, 0], sizes = [1, 32], strides = [1, 1]} : vector<2x32xf32> to vector<1x32xf32>
    %264 = vector.extract_strided_slice %236 {offsets = [1, 0], sizes = [1, 32], strides = [1, 1]} : vector<2x32xf32> to vector<1x32xf32>
    %265 = tpu.concatenate %257, %258, %259, %260, %261, %262, %263, %264 in 0 : vector<1x32xf32>, vector<1x32xf32>, vector<1x32xf32>, vector<1x32xf32>, vector<1x32xf32>, vector<1x32xf32>, vector<1x32xf32>, vector<1x32xf32> -> vector<8x32xf32>
    %266 = arith.index_cast %arg0 : i32 to index
    %c1 = arith.constant 1 : index
    %267 = memref.load %arg1[%266, %c1] : memref<3x2xi32, #tpu.memory_space<smem>>
    %268 = vector.broadcast %267 : i32 to vector<8x32xi32>
    %269 = arith.cmpi slt, %237, %268 : vector<8x32xi32>
    %270 = arith.extui %269 : vector<8x32xi1> to vector<8x32xi32>
    %271 = arith.sitofp %270 : vector<8x32xi32> to vector<8x32xf32>
    %272 = arith.mulf %265, %271 : vector<8x32xf32>
    %c0_49 = arith.constant 0 : index
    %c8 = arith.constant 8 : index
    %c0_50 = arith.constant 0 : index
    %273 = vector.load %arg6[%c0_49, %c8, %c0_50] : memref<1x16x32xf32, #tpu.memory_space<vmem>>, vector<1x8x32xf32>
    %274 = vector.shape_cast %273 : vector<1x8x32xf32> to vector<8x32xf32>
    %275 = vector.shape_cast %272 : vector<8x32xf32> to vector<1x8x32xf32>
    tpu.vector_store %arg6[%c0_49, %c8, %c0_50], %275 {strides = array<i32>} : memref<1x16x32xf32, #tpu.memory_space<vmem>>, vector<1x8x32xf32>,
    return
  }
  func.func @transform_0(%arg0: i32, %arg1: memref<3x2xi32, #tpu.memory_space<smem>>) -> (i32, i32, i32) {
    %c0_i32 = arith.constant 0 : i32
    %c0_i32_0 = arith.constant 0 : i32
    %c0_i32_1 = arith.constant 0 : i32
    return %arg0, %c0_i32, %c0_i32_0 : i32, i32, i32
  }
  func.func @transform_1(%arg0: i32, %arg1: memref<3x2xi32, #tpu.memory_space<smem>>) -> (i32, i32, i32) {
    %c0_i32 = arith.constant 0 : i32
    %c0_i32_0 = arith.constant 0 : i32
    %c0_i32_1 = arith.constant 0 : i32
    return %arg0, %c0_i32, %c0_i32_0 : i32, i32, i32
  }
  func.func @transform_2(%arg0: i32, %arg1: memref<3x2xi32, #tpu.memory_space<smem>>) -> (i32, i32, i32) {
    %c0_i32 = arith.constant 0 : i32
    %c0_i32_0 = arith.constant 0 : i32
    %c0_i32_1 = arith.constant 0 : i32
    return %arg0, %c0_i32, %c0_i32_0 : i32, i32, i32
  }
  func.func @transform_3(%arg0: i32, %arg1: memref<3x2xi32, #tpu.memory_space<smem>>) -> (i32, i32, i32) {
    %c0_i32 = arith.constant 0 : i32
    %c0_i32_0 = arith.constant 0 : i32
    %c0_i32_1 = arith.constant 0 : i32
    return %arg0, %c0_i32, %c0_i32_0 : i32, i32, i32
  }
  func.func @transform_4(%arg0: i32, %arg1: memref<3x2xi32, #tpu.memory_space<smem>>) -> (i32, i32, i32) {
    %c0_i32 = arith.constant 0 : i32
    %c0_i32_0 = arith.constant 0 : i32
    %c0_i32_1 = arith.constant 0 : i32
    return %arg0, %c0_i32, %c0_i32_0 : i32, i32, i32
  }
}

module attributes {stable_mosaic.version = 11 : i64} {
  func.func @_rot_attn_kernel(%arg0: memref<3x16x32xf32, #tpu.memory_space<vmem>>, %arg1: memref<2x1xf32, #tpu.memory_space<vmem>>, %arg2: memref<4x32x32xf32, #tpu.memory_space<vmem>>, %arg3: memref<4x1x32xf32, #tpu.memory_space<vmem>>, %arg4: memref<4x32x32xf32, #tpu.memory_space<vmem>>, %arg5: memref<4x1x32xf32, #tpu.memory_space<vmem>>, %arg6: memref<4x32x32xf32, #tpu.memory_space<vmem>>, %arg7: memref<4x32x32xf32, #tpu.memory_space<vmem>>, %arg8: memref<4x1x32xf32, #tpu.memory_space<vmem>>, %arg9: memref<128x3xf32, #tpu.memory_space<vmem>>, %arg10: memref<1x3xf32, #tpu.memory_space<vmem>>, %arg11: memref<2x3xf32, #tpu.memory_space<vmem>>) attributes {dimension_semantics = [], scalar_prefetch = 0 : i64, scratch_operands = 0 : i64, tpu.core_type = #tpu.core_type<tc>} {
    %c0 = arith.constant 0 : index
    %c0_0 = arith.constant 0 : index
    %c0_1 = arith.constant 0 : index
    %0 = vector.load %arg0[%c0, %c0_0, %c0_1] : memref<3x16x32xf32, #tpu.memory_space<vmem>>, vector<1x16x32xf32>
    %1 = vector.shape_cast %0 : vector<1x16x32xf32> to vector<16x32xf32>
    %c1 = arith.constant 1 : index
    %c0_2 = arith.constant 0 : index
    %c0_3 = arith.constant 0 : index
    %2 = vector.load %arg0[%c1, %c0_2, %c0_3] : memref<3x16x32xf32, #tpu.memory_space<vmem>>, vector<1x16x32xf32>
    %3 = vector.shape_cast %2 : vector<1x16x32xf32> to vector<16x32xf32>
    %c2 = arith.constant 2 : index
    %c0_4 = arith.constant 0 : index
    %c0_5 = arith.constant 0 : index
    %4 = vector.load %arg0[%c2, %c0_4, %c0_5] : memref<3x16x32xf32, #tpu.memory_space<vmem>>, vector<1x16x32xf32>
    %5 = vector.shape_cast %4 : vector<1x16x32xf32> to vector<16x32xf32>
    %6 = vector.extract_strided_slice %3 {offsets = [0, 0], sizes = [8, 32], strides = [1, 1]} : vector<16x32xf32> to vector<8x32xf32>
    %cst = arith.constant dense<0.000000e+00> : vector<32xf32>
    %7 = vector.multi_reduction <add>, %6, %cst [0] : vector<8x32xf32> to vector<32xf32>
    %8 = vector.shape_cast %7 : vector<32xf32> to vector<1x32xf32>
    %9 = vector.extract_strided_slice %3 {offsets = [8, 0], sizes = [8, 32], strides = [1, 1]} : vector<16x32xf32> to vector<8x32xf32>
    %cst_6 = arith.constant dense<0.000000e+00> : vector<32xf32>
    %10 = vector.multi_reduction <add>, %9, %cst_6 [0] : vector<8x32xf32> to vector<32xf32>
    %11 = vector.shape_cast %10 : vector<32xf32> to vector<1x32xf32>
    %12 = tpu.concatenate %8, %11 in 0 : vector<1x32xf32>, vector<1x32xf32> -> vector<2x32xf32>
    %c0_7 = arith.constant 0 : index
    %c0_8 = arith.constant 0 : index
    %13 = vector.load %arg1[%c0_7, %c0_8] : memref<2x1xf32, #tpu.memory_space<vmem>>, vector<2x1xf32>
    %14 = vector.broadcast %13 : vector<2x1xf32> to vector<2x32xf32>
    %15 = arith.mulf %12, %14 : vector<2x32xf32>
    %c0_9 = arith.constant 0 : index
    %c0_10 = arith.constant 0 : index
    %c0_11 = arith.constant 0 : index
    %16 = vector.load %arg2[%c0_9, %c0_10, %c0_11] : memref<4x32x32xf32, #tpu.memory_space<vmem>>, vector<1x32x32xf32>
    %17 = vector.shape_cast %16 : vector<1x32x32xf32> to vector<32x32xf32>
    %cst_12 = arith.constant dense<0.000000e+00> : vector<16x32xf32>
    %18 = tpu.matmul %1, %17, %cst_12 {dimension_numbers = #tpu.dot_dimension_numbers<[1], [0], [0], [1], [0, 0, 1, 1], [], []>} : vector<16x32xf32>, vector<32x32xf32>, vector<16x32xf32> -> vector<16x32xf32>
    %c0_13 = arith.constant 0 : index
    %c0_14 = arith.constant 0 : index
    %c0_15 = arith.constant 0 : index
    %19 = vector.load %arg3[%c0_13, %c0_14, %c0_15] : memref<4x1x32xf32, #tpu.memory_space<vmem>>, vector<1x1x32xf32>
    %20 = vector.shape_cast %19 : vector<1x1x32xf32> to vector<1x32xf32>
    %21 = vector.broadcast %20 : vector<1x32xf32> to vector<16x32xf32>
    %22 = arith.addf %18, %21 : vector<16x32xf32>
    %c0_16 = arith.constant 0 : index
    %c0_17 = arith.constant 0 : index
    %c0_18 = arith.constant 0 : index
    %23 = vector.load %arg4[%c0_16, %c0_17, %c0_18] : memref<4x32x32xf32, #tpu.memory_space<vmem>>, vector<1x32x32xf32>
    %24 = vector.shape_cast %23 : vector<1x32x32xf32> to vector<32x32xf32>
    %cst_19 = arith.constant dense<0.000000e+00> : vector<2x32xf32>
    %25 = tpu.matmul %15, %24, %cst_19 {dimension_numbers = #tpu.dot_dimension_numbers<[1], [0], [0], [1], [0, 0, 1, 1], [], []>} : vector<2x32xf32>, vector<32x32xf32>, vector<2x32xf32> -> vector<2x32xf32>
    %c0_20 = arith.constant 0 : index
    %c0_21 = arith.constant 0 : index
    %c0_22 = arith.constant 0 : index
    %26 = vector.load %arg5[%c0_20, %c0_21, %c0_22] : memref<4x1x32xf32, #tpu.memory_space<vmem>>, vector<1x1x32xf32>
    %27 = vector.shape_cast %26 : vector<1x1x32xf32> to vector<1x32xf32>
    %28 = vector.broadcast %27 : vector<1x32xf32> to vector<2x32xf32>
    %29 = arith.addf %25, %28 : vector<2x32xf32>
    %c0_23 = arith.constant 0 : index
    %c0_24 = arith.constant 0 : index
    %c0_25 = arith.constant 0 : index
    %30 = vector.load %arg6[%c0_23, %c0_24, %c0_25] : memref<4x32x32xf32, #tpu.memory_space<vmem>>, vector<1x32x32xf32>
    %31 = vector.shape_cast %30 : vector<1x32x32xf32> to vector<32x32xf32>
    %cst_26 = arith.constant dense<0.000000e+00> : vector<2x32xf32>
    %32 = tpu.matmul %29, %31, %cst_26 {dimension_numbers = #tpu.dot_dimension_numbers<[1], [0], [0], [1], [0, 0, 1, 1], [], []>} : vector<2x32xf32>, vector<32x32xf32>, vector<2x32xf32> -> vector<2x32xf32>
    %33 = vector.extract_strided_slice %22 {offsets = [0, 0], sizes = [8, 32], strides = [1, 1]} : vector<16x32xf32> to vector<8x32xf32>
    %34 = vector.extract_strided_slice %32 {offsets = [0, 0], sizes = [1, 32], strides = [1, 1]} : vector<2x32xf32> to vector<1x32xf32>
    %35 = vector.broadcast %34 : vector<1x32xf32> to vector<8x32xf32>
    %36 = arith.mulf %35, %33 : vector<8x32xf32>
    %cst_27 = arith.constant dense<0.000000e+00> : vector<8xf32>
    %37 = vector.multi_reduction <add>, %36, %cst_27 [1] : vector<8x32xf32> to vector<8xf32>
    %38 = vector.shape_cast %37 : vector<8xf32> to vector<8x1xf32>
    %cst_28 = arith.constant dense<0xFF800000> : vector<1xf32>
    %39 = vector.multi_reduction <maximumf>, %38, %cst_28 [0] : vector<8x1xf32> to vector<1xf32>
    %40 = vector.shape_cast %39 : vector<1xf32> to vector<1x1xf32>
    %41 = vector.broadcast %40 : vector<1x1xf32> to vector<8x1xf32>
    %42 = arith.subf %38, %41 : vector<8x1xf32>
    %43 = math.exp %42 : vector<8x1xf32>
    %cst_29 = arith.constant dense<0.000000e+00> : vector<1xf32>
    %44 = vector.multi_reduction <add>, %43, %cst_29 [0] : vector<8x1xf32> to vector<1xf32>
    %45 = vector.shape_cast %44 : vector<1xf32> to vector<1x1xf32>
    %46 = vector.broadcast %45 : vector<1x1xf32> to vector<8x1xf32>
    %47 = arith.divf %43, %46 : vector<8x1xf32>
    %48 = vector.broadcast %47 : vector<8x1xf32> to vector<8x32xf32>
    %49 = arith.mulf %48, %33 : vector<8x32xf32>
    %cst_30 = arith.constant dense<0.000000e+00> : vector<32xf32>
    %50 = vector.multi_reduction <add>, %49, %cst_30 [0] : vector<8x32xf32> to vector<32xf32>
    %51 = vector.shape_cast %50 : vector<32xf32> to vector<1x32xf32>
    %52 = vector.extract_strided_slice %22 {offsets = [8, 0], sizes = [8, 32], strides = [1, 1]} : vector<16x32xf32> to vector<8x32xf32>
    %53 = vector.extract_strided_slice %32 {offsets = [1, 0], sizes = [1, 32], strides = [1, 1]} : vector<2x32xf32> to vector<1x32xf32>
    %54 = vector.broadcast %53 : vector<1x32xf32> to vector<8x32xf32>
    %55 = arith.mulf %54, %52 : vector<8x32xf32>
    %cst_31 = arith.constant dense<0.000000e+00> : vector<8xf32>
    %56 = vector.multi_reduction <add>, %55, %cst_31 [1] : vector<8x32xf32> to vector<8xf32>
    %57 = vector.shape_cast %56 : vector<8xf32> to vector<8x1xf32>
    %cst_32 = arith.constant dense<0xFF800000> : vector<1xf32>
    %58 = vector.multi_reduction <maximumf>, %57, %cst_32 [0] : vector<8x1xf32> to vector<1xf32>
    %59 = vector.shape_cast %58 : vector<1xf32> to vector<1x1xf32>
    %60 = vector.broadcast %59 : vector<1x1xf32> to vector<8x1xf32>
    %61 = arith.subf %57, %60 : vector<8x1xf32>
    %62 = math.exp %61 : vector<8x1xf32>
    %cst_33 = arith.constant dense<0.000000e+00> : vector<1xf32>
    %63 = vector.multi_reduction <add>, %62, %cst_33 [0] : vector<8x1xf32> to vector<1xf32>
    %64 = vector.shape_cast %63 : vector<1xf32> to vector<1x1xf32>
    %65 = vector.broadcast %64 : vector<1x1xf32> to vector<8x1xf32>
    %66 = arith.divf %62, %65 : vector<8x1xf32>
    %67 = vector.broadcast %66 : vector<8x1xf32> to vector<8x32xf32>
    %68 = arith.mulf %67, %52 : vector<8x32xf32>
    %cst_34 = arith.constant dense<0.000000e+00> : vector<32xf32>
    %69 = vector.multi_reduction <add>, %68, %cst_34 [0] : vector<8x32xf32> to vector<32xf32>
    %70 = vector.shape_cast %69 : vector<32xf32> to vector<1x32xf32>
    %71 = tpu.concatenate %51, %70 in 0 : vector<1x32xf32>, vector<1x32xf32> -> vector<2x32xf32>
    %c0_35 = arith.constant 0 : index
    %c0_36 = arith.constant 0 : index
    %c0_37 = arith.constant 0 : index
    %72 = vector.load %arg7[%c0_35, %c0_36, %c0_37] : memref<4x32x32xf32, #tpu.memory_space<vmem>>, vector<1x32x32xf32>
    %73 = vector.shape_cast %72 : vector<1x32x32xf32> to vector<32x32xf32>
    %cst_38 = arith.constant dense<0.000000e+00> : vector<2x32xf32>
    %74 = tpu.matmul %71, %73, %cst_38 {dimension_numbers = #tpu.dot_dimension_numbers<[1], [0], [0], [1], [0, 0, 1, 1], [], []>} : vector<2x32xf32>, vector<32x32xf32>, vector<2x32xf32> -> vector<2x32xf32>
    %c0_39 = arith.constant 0 : index
    %c0_40 = arith.constant 0 : index
    %c0_41 = arith.constant 0 : index
    %75 = vector.load %arg8[%c0_39, %c0_40, %c0_41] : memref<4x1x32xf32, #tpu.memory_space<vmem>>, vector<1x1x32xf32>
    %76 = vector.shape_cast %75 : vector<1x1x32xf32> to vector<1x32xf32>
    %77 = vector.broadcast %76 : vector<1x32xf32> to vector<2x32xf32>
    %78 = arith.addf %74, %77 : vector<2x32xf32>
    %c1_42 = arith.constant 1 : index
    %c0_43 = arith.constant 0 : index
    %c0_44 = arith.constant 0 : index
    %79 = vector.load %arg2[%c1_42, %c0_43, %c0_44] : memref<4x32x32xf32, #tpu.memory_space<vmem>>, vector<1x32x32xf32>
    %80 = vector.shape_cast %79 : vector<1x32x32xf32> to vector<32x32xf32>
    %cst_45 = arith.constant dense<0.000000e+00> : vector<16x32xf32>
    %81 = tpu.matmul %5, %80, %cst_45 {dimension_numbers = #tpu.dot_dimension_numbers<[1], [0], [0], [1], [0, 0, 1, 1], [], []>} : vector<16x32xf32>, vector<32x32xf32>, vector<16x32xf32> -> vector<16x32xf32>
    %c1_46 = arith.constant 1 : index
    %c0_47 = arith.constant 0 : index
    %c0_48 = arith.constant 0 : index
    %82 = vector.load %arg3[%c1_46, %c0_47, %c0_48] : memref<4x1x32xf32, #tpu.memory_space<vmem>>, vector<1x1x32xf32>
    %83 = vector.shape_cast %82 : vector<1x1x32xf32> to vector<1x32xf32>
    %84 = vector.broadcast %83 : vector<1x32xf32> to vector<16x32xf32>
    %85 = arith.addf %81, %84 : vector<16x32xf32>
    %c1_49 = arith.constant 1 : index
    %c0_50 = arith.constant 0 : index
    %c0_51 = arith.constant 0 : index
    %86 = vector.load %arg4[%c1_49, %c0_50, %c0_51] : memref<4x32x32xf32, #tpu.memory_space<vmem>>, vector<1x32x32xf32>
    %87 = vector.shape_cast %86 : vector<1x32x32xf32> to vector<32x32xf32>
    %cst_52 = arith.constant dense<0.000000e+00> : vector<2x32xf32>
    %88 = tpu.matmul %15, %87, %cst_52 {dimension_numbers = #tpu.dot_dimension_numbers<[1], [0], [0], [1], [0, 0, 1, 1], [], []>} : vector<2x32xf32>, vector<32x32xf32>, vector<2x32xf32> -> vector<2x32xf32>
    %c1_53 = arith.constant 1 : index
    %c0_54 = arith.constant 0 : index
    %c0_55 = arith.constant 0 : index
    %89 = vector.load %arg5[%c1_53, %c0_54, %c0_55] : memref<4x1x32xf32, #tpu.memory_space<vmem>>, vector<1x1x32xf32>
    %90 = vector.shape_cast %89 : vector<1x1x32xf32> to vector<1x32xf32>
    %91 = vector.broadcast %90 : vector<1x32xf32> to vector<2x32xf32>
    %92 = arith.addf %88, %91 : vector<2x32xf32>
    %c1_56 = arith.constant 1 : index
    %c0_57 = arith.constant 0 : index
    %c0_58 = arith.constant 0 : index
    %93 = vector.load %arg6[%c1_56, %c0_57, %c0_58] : memref<4x32x32xf32, #tpu.memory_space<vmem>>, vector<1x32x32xf32>
    %94 = vector.shape_cast %93 : vector<1x32x32xf32> to vector<32x32xf32>
    %cst_59 = arith.constant dense<0.000000e+00> : vector<2x32xf32>
    %95 = tpu.matmul %92, %94, %cst_59 {dimension_numbers = #tpu.dot_dimension_numbers<[1], [0], [0], [1], [0, 0, 1, 1], [], []>} : vector<2x32xf32>, vector<32x32xf32>, vector<2x32xf32> -> vector<2x32xf32>
    %96 = vector.extract_strided_slice %85 {offsets = [0, 0], sizes = [8, 32], strides = [1, 1]} : vector<16x32xf32> to vector<8x32xf32>
    %97 = vector.extract_strided_slice %95 {offsets = [0, 0], sizes = [1, 32], strides = [1, 1]} : vector<2x32xf32> to vector<1x32xf32>
    %98 = vector.broadcast %97 : vector<1x32xf32> to vector<8x32xf32>
    %99 = arith.mulf %98, %96 : vector<8x32xf32>
    %cst_60 = arith.constant dense<0.000000e+00> : vector<8xf32>
    %100 = vector.multi_reduction <add>, %99, %cst_60 [1] : vector<8x32xf32> to vector<8xf32>
    %101 = vector.shape_cast %100 : vector<8xf32> to vector<8x1xf32>
    %cst_61 = arith.constant dense<0xFF800000> : vector<1xf32>
    %102 = vector.multi_reduction <maximumf>, %101, %cst_61 [0] : vector<8x1xf32> to vector<1xf32>
    %103 = vector.shape_cast %102 : vector<1xf32> to vector<1x1xf32>
    %104 = vector.broadcast %103 : vector<1x1xf32> to vector<8x1xf32>
    %105 = arith.subf %101, %104 : vector<8x1xf32>
    %106 = math.exp %105 : vector<8x1xf32>
    %cst_62 = arith.constant dense<0.000000e+00> : vector<1xf32>
    %107 = vector.multi_reduction <add>, %106, %cst_62 [0] : vector<8x1xf32> to vector<1xf32>
    %108 = vector.shape_cast %107 : vector<1xf32> to vector<1x1xf32>
    %109 = vector.broadcast %108 : vector<1x1xf32> to vector<8x1xf32>
    %110 = arith.divf %106, %109 : vector<8x1xf32>
    %111 = vector.broadcast %110 : vector<8x1xf32> to vector<8x32xf32>
    %112 = arith.mulf %111, %96 : vector<8x32xf32>
    %cst_63 = arith.constant dense<0.000000e+00> : vector<32xf32>
    %113 = vector.multi_reduction <add>, %112, %cst_63 [0] : vector<8x32xf32> to vector<32xf32>
    %114 = vector.shape_cast %113 : vector<32xf32> to vector<1x32xf32>
    %115 = vector.extract_strided_slice %85 {offsets = [8, 0], sizes = [8, 32], strides = [1, 1]} : vector<16x32xf32> to vector<8x32xf32>
    %116 = vector.extract_strided_slice %95 {offsets = [1, 0], sizes = [1, 32], strides = [1, 1]} : vector<2x32xf32> to vector<1x32xf32>
    %117 = vector.broadcast %116 : vector<1x32xf32> to vector<8x32xf32>
    %118 = arith.mulf %117, %115 : vector<8x32xf32>
    %cst_64 = arith.constant dense<0.000000e+00> : vector<8xf32>
    %119 = vector.multi_reduction <add>, %118, %cst_64 [1] : vector<8x32xf32> to vector<8xf32>
    %120 = vector.shape_cast %119 : vector<8xf32> to vector<8x1xf32>
    %cst_65 = arith.constant dense<0xFF800000> : vector<1xf32>
    %121 = vector.multi_reduction <maximumf>, %120, %cst_65 [0] : vector<8x1xf32> to vector<1xf32>
    %122 = vector.shape_cast %121 : vector<1xf32> to vector<1x1xf32>
    %123 = vector.broadcast %122 : vector<1x1xf32> to vector<8x1xf32>
    %124 = arith.subf %120, %123 : vector<8x1xf32>
    %125 = math.exp %124 : vector<8x1xf32>
    %cst_66 = arith.constant dense<0.000000e+00> : vector<1xf32>
    %126 = vector.multi_reduction <add>, %125, %cst_66 [0] : vector<8x1xf32> to vector<1xf32>
    %127 = vector.shape_cast %126 : vector<1xf32> to vector<1x1xf32>
    %128 = vector.broadcast %127 : vector<1x1xf32> to vector<8x1xf32>
    %129 = arith.divf %125, %128 : vector<8x1xf32>
    %130 = vector.broadcast %129 : vector<8x1xf32> to vector<8x32xf32>
    %131 = arith.mulf %130, %115 : vector<8x32xf32>
    %cst_67 = arith.constant dense<0.000000e+00> : vector<32xf32>
    %132 = vector.multi_reduction <add>, %131, %cst_67 [0] : vector<8x32xf32> to vector<32xf32>
    %133 = vector.shape_cast %132 : vector<32xf32> to vector<1x32xf32>
    %134 = tpu.concatenate %114, %133 in 0 : vector<1x32xf32>, vector<1x32xf32> -> vector<2x32xf32>
    %c1_68 = arith.constant 1 : index
    %c0_69 = arith.constant 0 : index
    %c0_70 = arith.constant 0 : index
    %135 = vector.load %arg7[%c1_68, %c0_69, %c0_70] : memref<4x32x32xf32, #tpu.memory_space<vmem>>, vector<1x32x32xf32>
    %136 = vector.shape_cast %135 : vector<1x32x32xf32> to vector<32x32xf32>
    %cst_71 = arith.constant dense<0.000000e+00> : vector<2x32xf32>
    %137 = tpu.matmul %134, %136, %cst_71 {dimension_numbers = #tpu.dot_dimension_numbers<[1], [0], [0], [1], [0, 0, 1, 1], [], []>} : vector<2x32xf32>, vector<32x32xf32>, vector<2x32xf32> -> vector<2x32xf32>
    %c1_72 = arith.constant 1 : index
    %c0_73 = arith.constant 0 : index
    %c0_74 = arith.constant 0 : index
    %138 = vector.load %arg8[%c1_72, %c0_73, %c0_74] : memref<4x1x32xf32, #tpu.memory_space<vmem>>, vector<1x1x32xf32>
    %139 = vector.shape_cast %138 : vector<1x1x32xf32> to vector<1x32xf32>
    %140 = vector.broadcast %139 : vector<1x32xf32> to vector<2x32xf32>
    %141 = arith.addf %137, %140 : vector<2x32xf32>
    %c2_75 = arith.constant 2 : index
    %c0_76 = arith.constant 0 : index
    %c0_77 = arith.constant 0 : index
    %142 = vector.load %arg2[%c2_75, %c0_76, %c0_77] : memref<4x32x32xf32, #tpu.memory_space<vmem>>, vector<1x32x32xf32>
    %143 = vector.shape_cast %142 : vector<1x32x32xf32> to vector<32x32xf32>
    %cst_78 = arith.constant dense<0.000000e+00> : vector<16x32xf32>
    %144 = tpu.matmul %3, %143, %cst_78 {dimension_numbers = #tpu.dot_dimension_numbers<[1], [0], [0], [1], [0, 0, 1, 1], [], []>} : vector<16x32xf32>, vector<32x32xf32>, vector<16x32xf32> -> vector<16x32xf32>
    %c2_79 = arith.constant 2 : index
    %c0_80 = arith.constant 0 : index
    %c0_81 = arith.constant 0 : index
    %145 = vector.load %arg3[%c2_79, %c0_80, %c0_81] : memref<4x1x32xf32, #tpu.memory_space<vmem>>, vector<1x1x32xf32>
    %146 = vector.shape_cast %145 : vector<1x1x32xf32> to vector<1x32xf32>
    %147 = vector.broadcast %146 : vector<1x32xf32> to vector<16x32xf32>
    %148 = arith.addf %144, %147 : vector<16x32xf32>
    %c2_82 = arith.constant 2 : index
    %c0_83 = arith.constant 0 : index
    %c0_84 = arith.constant 0 : index
    %149 = vector.load %arg4[%c2_82, %c0_83, %c0_84] : memref<4x32x32xf32, #tpu.memory_space<vmem>>, vector<1x32x32xf32>
    %150 = vector.shape_cast %149 : vector<1x32x32xf32> to vector<32x32xf32>
    %cst_85 = arith.constant dense<0.000000e+00> : vector<2x32xf32>
    %151 = tpu.matmul %78, %150, %cst_85 {dimension_numbers = #tpu.dot_dimension_numbers<[1], [0], [0], [1], [0, 0, 1, 1], [], []>} : vector<2x32xf32>, vector<32x32xf32>, vector<2x32xf32> -> vector<2x32xf32>
    %c2_86 = arith.constant 2 : index
    %c0_87 = arith.constant 0 : index
    %c0_88 = arith.constant 0 : index
    %152 = vector.load %arg5[%c2_86, %c0_87, %c0_88] : memref<4x1x32xf32, #tpu.memory_space<vmem>>, vector<1x1x32xf32>
    %153 = vector.shape_cast %152 : vector<1x1x32xf32> to vector<1x32xf32>
    %154 = vector.broadcast %153 : vector<1x32xf32> to vector<2x32xf32>
    %155 = arith.addf %151, %154 : vector<2x32xf32>
    %c2_89 = arith.constant 2 : index
    %c0_90 = arith.constant 0 : index
    %c0_91 = arith.constant 0 : index
    %156 = vector.load %arg6[%c2_89, %c0_90, %c0_91] : memref<4x32x32xf32, #tpu.memory_space<vmem>>, vector<1x32x32xf32>
    %157 = vector.shape_cast %156 : vector<1x32x32xf32> to vector<32x32xf32>
    %cst_92 = arith.constant dense<0.000000e+00> : vector<2x32xf32>
    %158 = tpu.matmul %155, %157, %cst_92 {dimension_numbers = #tpu.dot_dimension_numbers<[1], [0], [0], [1], [0, 0, 1, 1], [], []>} : vector<2x32xf32>, vector<32x32xf32>, vector<2x32xf32> -> vector<2x32xf32>
    %159 = vector.extract_strided_slice %148 {offsets = [0, 0], sizes = [8, 32], strides = [1, 1]} : vector<16x32xf32> to vector<8x32xf32>
    %160 = vector.extract_strided_slice %158 {offsets = [0, 0], sizes = [1, 32], strides = [1, 1]} : vector<2x32xf32> to vector<1x32xf32>
    %161 = vector.broadcast %160 : vector<1x32xf32> to vector<8x32xf32>
    %162 = arith.mulf %161, %159 : vector<8x32xf32>
    %cst_93 = arith.constant dense<0.000000e+00> : vector<8xf32>
    %163 = vector.multi_reduction <add>, %162, %cst_93 [1] : vector<8x32xf32> to vector<8xf32>
    %164 = vector.shape_cast %163 : vector<8xf32> to vector<8x1xf32>
    %cst_94 = arith.constant dense<0xFF800000> : vector<1xf32>
    %165 = vector.multi_reduction <maximumf>, %164, %cst_94 [0] : vector<8x1xf32> to vector<1xf32>
    %166 = vector.shape_cast %165 : vector<1xf32> to vector<1x1xf32>
    %167 = vector.broadcast %166 : vector<1x1xf32> to vector<8x1xf32>
    %168 = arith.subf %164, %167 : vector<8x1xf32>
    %169 = math.exp %168 : vector<8x1xf32>
    %cst_95 = arith.constant dense<0.000000e+00> : vector<1xf32>
    %170 = vector.multi_reduction <add>, %169, %cst_95 [0] : vector<8x1xf32> to vector<1xf32>
    %171 = vector.shape_cast %170 : vector<1xf32> to vector<1x1xf32>
    %172 = vector.broadcast %171 : vector<1x1xf32> to vector<8x1xf32>
    %173 = arith.divf %169, %172 : vector<8x1xf32>
    %174 = vector.broadcast %173 : vector<8x1xf32> to vector<8x32xf32>
    %175 = arith.mulf %174, %159 : vector<8x32xf32>
    %cst_96 = arith.constant dense<0.000000e+00> : vector<32xf32>
    %176 = vector.multi_reduction <add>, %175, %cst_96 [0] : vector<8x32xf32> to vector<32xf32>
    %177 = vector.shape_cast %176 : vector<32xf32> to vector<1x32xf32>
    %178 = vector.extract_strided_slice %148 {offsets = [8, 0], sizes = [8, 32], strides = [1, 1]} : vector<16x32xf32> to vector<8x32xf32>
    %179 = vector.extract_strided_slice %158 {offsets = [1, 0], sizes = [1, 32], strides = [1, 1]} : vector<2x32xf32> to vector<1x32xf32>
    %180 = vector.broadcast %179 : vector<1x32xf32> to vector<8x32xf32>
    %181 = arith.mulf %180, %178 : vector<8x32xf32>
    %cst_97 = arith.constant dense<0.000000e+00> : vector<8xf32>
    %182 = vector.multi_reduction <add>, %181, %cst_97 [1] : vector<8x32xf32> to vector<8xf32>
    %183 = vector.shape_cast %182 : vector<8xf32> to vector<8x1xf32>
    %cst_98 = arith.constant dense<0xFF800000> : vector<1xf32>
    %184 = vector.multi_reduction <maximumf>, %183, %cst_98 [0] : vector<8x1xf32> to vector<1xf32>
    %185 = vector.shape_cast %184 : vector<1xf32> to vector<1x1xf32>
    %186 = vector.broadcast %185 : vector<1x1xf32> to vector<8x1xf32>
    %187 = arith.subf %183, %186 : vector<8x1xf32>
    %188 = math.exp %187 : vector<8x1xf32>
    %cst_99 = arith.constant dense<0.000000e+00> : vector<1xf32>
    %189 = vector.multi_reduction <add>, %188, %cst_99 [0] : vector<8x1xf32> to vector<1xf32>
    %190 = vector.shape_cast %189 : vector<1xf32> to vector<1x1xf32>
    %191 = vector.broadcast %190 : vector<1x1xf32> to vector<8x1xf32>
    %192 = arith.divf %188, %191 : vector<8x1xf32>
    %193 = vector.broadcast %192 : vector<8x1xf32> to vector<8x32xf32>
    %194 = arith.mulf %193, %178 : vector<8x32xf32>
    %cst_100 = arith.constant dense<0.000000e+00> : vector<32xf32>
    %195 = vector.multi_reduction <add>, %194, %cst_100 [0] : vector<8x32xf32> to vector<32xf32>
    %196 = vector.shape_cast %195 : vector<32xf32> to vector<1x32xf32>
    %197 = tpu.concatenate %177, %196 in 0 : vector<1x32xf32>, vector<1x32xf32> -> vector<2x32xf32>
    %c2_101 = arith.constant 2 : index
    %c0_102 = arith.constant 0 : index
    %c0_103 = arith.constant 0 : index
    %198 = vector.load %arg7[%c2_101, %c0_102, %c0_103] : memref<4x32x32xf32, #tpu.memory_space<vmem>>, vector<1x32x32xf32>
    %199 = vector.shape_cast %198 : vector<1x32x32xf32> to vector<32x32xf32>
    %cst_104 = arith.constant dense<0.000000e+00> : vector<2x32xf32>
    %200 = tpu.matmul %197, %199, %cst_104 {dimension_numbers = #tpu.dot_dimension_numbers<[1], [0], [0], [1], [0, 0, 1, 1], [], []>} : vector<2x32xf32>, vector<32x32xf32>, vector<2x32xf32> -> vector<2x32xf32>
    %c2_105 = arith.constant 2 : index
    %c0_106 = arith.constant 0 : index
    %c0_107 = arith.constant 0 : index
    %201 = vector.load %arg8[%c2_105, %c0_106, %c0_107] : memref<4x1x32xf32, #tpu.memory_space<vmem>>, vector<1x1x32xf32>
    %202 = vector.shape_cast %201 : vector<1x1x32xf32> to vector<1x32xf32>
    %203 = vector.broadcast %202 : vector<1x32xf32> to vector<2x32xf32>
    %204 = arith.addf %200, %203 : vector<2x32xf32>
    %c3 = arith.constant 3 : index
    %c0_108 = arith.constant 0 : index
    %c0_109 = arith.constant 0 : index
    %205 = vector.load %arg2[%c3, %c0_108, %c0_109] : memref<4x32x32xf32, #tpu.memory_space<vmem>>, vector<1x32x32xf32>
    %206 = vector.shape_cast %205 : vector<1x32x32xf32> to vector<32x32xf32>
    %cst_110 = arith.constant dense<0.000000e+00> : vector<16x32xf32>
    %207 = tpu.matmul %3, %206, %cst_110 {dimension_numbers = #tpu.dot_dimension_numbers<[1], [0], [0], [1], [0, 0, 1, 1], [], []>} : vector<16x32xf32>, vector<32x32xf32>, vector<16x32xf32> -> vector<16x32xf32>
    %c3_111 = arith.constant 3 : index
    %c0_112 = arith.constant 0 : index
    %c0_113 = arith.constant 0 : index
    %208 = vector.load %arg3[%c3_111, %c0_112, %c0_113] : memref<4x1x32xf32, #tpu.memory_space<vmem>>, vector<1x1x32xf32>
    %209 = vector.shape_cast %208 : vector<1x1x32xf32> to vector<1x32xf32>
    %210 = vector.broadcast %209 : vector<1x32xf32> to vector<16x32xf32>
    %211 = arith.addf %207, %210 : vector<16x32xf32>
    %c3_114 = arith.constant 3 : index
    %c0_115 = arith.constant 0 : index
    %c0_116 = arith.constant 0 : index
    %212 = vector.load %arg4[%c3_114, %c0_115, %c0_116] : memref<4x32x32xf32, #tpu.memory_space<vmem>>, vector<1x32x32xf32>
    %213 = vector.shape_cast %212 : vector<1x32x32xf32> to vector<32x32xf32>
    %cst_117 = arith.constant dense<0.000000e+00> : vector<2x32xf32>
    %214 = tpu.matmul %141, %213, %cst_117 {dimension_numbers = #tpu.dot_dimension_numbers<[1], [0], [0], [1], [0, 0, 1, 1], [], []>} : vector<2x32xf32>, vector<32x32xf32>, vector<2x32xf32> -> vector<2x32xf32>
    %c3_118 = arith.constant 3 : index
    %c0_119 = arith.constant 0 : index
    %c0_120 = arith.constant 0 : index
    %215 = vector.load %arg5[%c3_118, %c0_119, %c0_120] : memref<4x1x32xf32, #tpu.memory_space<vmem>>, vector<1x1x32xf32>
    %216 = vector.shape_cast %215 : vector<1x1x32xf32> to vector<1x32xf32>
    %217 = vector.broadcast %216 : vector<1x32xf32> to vector<2x32xf32>
    %218 = arith.addf %214, %217 : vector<2x32xf32>
    %c3_121 = arith.constant 3 : index
    %c0_122 = arith.constant 0 : index
    %c0_123 = arith.constant 0 : index
    %219 = vector.load %arg6[%c3_121, %c0_122, %c0_123] : memref<4x32x32xf32, #tpu.memory_space<vmem>>, vector<1x32x32xf32>
    %220 = vector.shape_cast %219 : vector<1x32x32xf32> to vector<32x32xf32>
    %cst_124 = arith.constant dense<0.000000e+00> : vector<2x32xf32>
    %221 = tpu.matmul %218, %220, %cst_124 {dimension_numbers = #tpu.dot_dimension_numbers<[1], [0], [0], [1], [0, 0, 1, 1], [], []>} : vector<2x32xf32>, vector<32x32xf32>, vector<2x32xf32> -> vector<2x32xf32>
    %222 = vector.extract_strided_slice %211 {offsets = [0, 0], sizes = [8, 32], strides = [1, 1]} : vector<16x32xf32> to vector<8x32xf32>
    %223 = vector.extract_strided_slice %221 {offsets = [0, 0], sizes = [1, 32], strides = [1, 1]} : vector<2x32xf32> to vector<1x32xf32>
    %224 = vector.broadcast %223 : vector<1x32xf32> to vector<8x32xf32>
    %225 = arith.mulf %224, %222 : vector<8x32xf32>
    %cst_125 = arith.constant dense<0.000000e+00> : vector<8xf32>
    %226 = vector.multi_reduction <add>, %225, %cst_125 [1] : vector<8x32xf32> to vector<8xf32>
    %227 = vector.shape_cast %226 : vector<8xf32> to vector<8x1xf32>
    %cst_126 = arith.constant dense<0xFF800000> : vector<1xf32>
    %228 = vector.multi_reduction <maximumf>, %227, %cst_126 [0] : vector<8x1xf32> to vector<1xf32>
    %229 = vector.shape_cast %228 : vector<1xf32> to vector<1x1xf32>
    %230 = vector.broadcast %229 : vector<1x1xf32> to vector<8x1xf32>
    %231 = arith.subf %227, %230 : vector<8x1xf32>
    %232 = math.exp %231 : vector<8x1xf32>
    %cst_127 = arith.constant dense<0.000000e+00> : vector<1xf32>
    %233 = vector.multi_reduction <add>, %232, %cst_127 [0] : vector<8x1xf32> to vector<1xf32>
    %234 = vector.shape_cast %233 : vector<1xf32> to vector<1x1xf32>
    %235 = vector.broadcast %234 : vector<1x1xf32> to vector<8x1xf32>
    %236 = arith.divf %232, %235 : vector<8x1xf32>
    %237 = vector.broadcast %236 : vector<8x1xf32> to vector<8x32xf32>
    %238 = arith.mulf %237, %222 : vector<8x32xf32>
    %cst_128 = arith.constant dense<0.000000e+00> : vector<32xf32>
    %239 = vector.multi_reduction <add>, %238, %cst_128 [0] : vector<8x32xf32> to vector<32xf32>
    %240 = vector.shape_cast %239 : vector<32xf32> to vector<1x32xf32>
    %241 = vector.extract_strided_slice %211 {offsets = [8, 0], sizes = [8, 32], strides = [1, 1]} : vector<16x32xf32> to vector<8x32xf32>
    %242 = vector.extract_strided_slice %221 {offsets = [1, 0], sizes = [1, 32], strides = [1, 1]} : vector<2x32xf32> to vector<1x32xf32>
    %243 = vector.broadcast %242 : vector<1x32xf32> to vector<8x32xf32>
    %244 = arith.mulf %243, %241 : vector<8x32xf32>
    %cst_129 = arith.constant dense<0.000000e+00> : vector<8xf32>
    %245 = vector.multi_reduction <add>, %244, %cst_129 [1] : vector<8x32xf32> to vector<8xf32>
    %246 = vector.shape_cast %245 : vector<8xf32> to vector<8x1xf32>
    %cst_130 = arith.constant dense<0xFF800000> : vector<1xf32>
    %247 = vector.multi_reduction <maximumf>, %246, %cst_130 [0] : vector<8x1xf32> to vector<1xf32>
    %248 = vector.shape_cast %247 : vector<1xf32> to vector<1x1xf32>
    %249 = vector.broadcast %248 : vector<1x1xf32> to vector<8x1xf32>
    %250 = arith.subf %246, %249 : vector<8x1xf32>
    %251 = math.exp %250 : vector<8x1xf32>
    %cst_131 = arith.constant dense<0.000000e+00> : vector<1xf32>
    %252 = vector.multi_reduction <add>, %251, %cst_131 [0] : vector<8x1xf32> to vector<1xf32>
    %253 = vector.shape_cast %252 : vector<1xf32> to vector<1x1xf32>
    %254 = vector.broadcast %253 : vector<1x1xf32> to vector<8x1xf32>
    %255 = arith.divf %251, %254 : vector<8x1xf32>
    %256 = vector.broadcast %255 : vector<8x1xf32> to vector<8x32xf32>
    %257 = arith.mulf %256, %241 : vector<8x32xf32>
    %cst_132 = arith.constant dense<0.000000e+00> : vector<32xf32>
    %258 = vector.multi_reduction <add>, %257, %cst_132 [0] : vector<8x32xf32> to vector<32xf32>
    %259 = vector.shape_cast %258 : vector<32xf32> to vector<1x32xf32>
    %260 = tpu.concatenate %240, %259 in 0 : vector<1x32xf32>, vector<1x32xf32> -> vector<2x32xf32>
    %c3_133 = arith.constant 3 : index
    %c0_134 = arith.constant 0 : index
    %c0_135 = arith.constant 0 : index
    %261 = vector.load %arg7[%c3_133, %c0_134, %c0_135] : memref<4x32x32xf32, #tpu.memory_space<vmem>>, vector<1x32x32xf32>
    %262 = vector.shape_cast %261 : vector<1x32x32xf32> to vector<32x32xf32>
    %cst_136 = arith.constant dense<0.000000e+00> : vector<2x32xf32>
    %263 = tpu.matmul %260, %262, %cst_136 {dimension_numbers = #tpu.dot_dimension_numbers<[1], [0], [0], [1], [0, 0, 1, 1], [], []>} : vector<2x32xf32>, vector<32x32xf32>, vector<2x32xf32> -> vector<2x32xf32>
    %c3_137 = arith.constant 3 : index
    %c0_138 = arith.constant 0 : index
    %c0_139 = arith.constant 0 : index
    %264 = vector.load %arg8[%c3_137, %c0_138, %c0_139] : memref<4x1x32xf32, #tpu.memory_space<vmem>>, vector<1x1x32xf32>
    %265 = vector.shape_cast %264 : vector<1x1x32xf32> to vector<1x32xf32>
    %266 = vector.broadcast %265 : vector<1x32xf32> to vector<2x32xf32>
    %267 = arith.addf %263, %266 : vector<2x32xf32>
    %268 = tpu.concatenate %78, %204, %267, %141 in 1 : vector<2x32xf32>, vector<2x32xf32>, vector<2x32xf32>, vector<2x32xf32> -> vector<2x128xf32>
    %c0_140 = arith.constant 0 : index
    %c0_141 = arith.constant 0 : index
    %269 = vector.load %arg9[%c0_140, %c0_141] : memref<128x3xf32, #tpu.memory_space<vmem>>, vector<128x3xf32>
    %cst_142 = arith.constant dense<0.000000e+00> : vector<2x3xf32>
    %270 = tpu.matmul %268, %269, %cst_142 {dimension_numbers = #tpu.dot_dimension_numbers<[1], [0], [0], [1], [0, 0, 1, 1], [], []>} : vector<2x128xf32>, vector<128x3xf32>, vector<2x3xf32> -> vector<2x3xf32>
    %c0_143 = arith.constant 0 : index
    %c0_144 = arith.constant 0 : index
    %271 = vector.load %arg10[%c0_143, %c0_144] : memref<1x3xf32, #tpu.memory_space<vmem>>, vector<1x3xf32>
    %272 = vector.broadcast %271 : vector<1x3xf32> to vector<2x3xf32>
    %273 = arith.addf %270, %272 : vector<2x3xf32>
    %cst_145 = arith.constant dense<0xFF800000> : vector<2xf32>
    %274 = vector.multi_reduction <maximumf>, %273, %cst_145 [1] : vector<2x3xf32> to vector<2xf32>
    %cst_146 = arith.constant 0xFF800000 : f32
    %275 = vector.broadcast %cst_146 : f32 to vector<2xf32>
    %276 = arith.maximumf %275, %274 : vector<2xf32>
    %277 = vector.shape_cast %276 : vector<2xf32> to vector<2x1xf32>
    %278 = vector.broadcast %277 : vector<2x1xf32> to vector<2x3xf32>
    %279 = arith.subf %273, %278 : vector<2x3xf32>
    %280 = math.exp %279 : vector<2x3xf32>
    %cst_147 = arith.constant dense<0.000000e+00> : vector<2xf32>
    %281 = vector.multi_reduction <add>, %280, %cst_147 [1] : vector<2x3xf32> to vector<2xf32>
    %282 = vector.shape_cast %281 : vector<2xf32> to vector<2x1xf32>
    %283 = vector.broadcast %282 : vector<2x1xf32> to vector<2x3xf32>
    %284 = arith.divf %280, %283 : vector<2x3xf32>
    %c0_148 = arith.constant 0 : index
    %c0_149 = arith.constant 0 : index
    %285 = vector.load %arg11[%c0_148, %c0_149] : memref<2x3xf32, #tpu.memory_space<vmem>>, vector<2x3xf32>
    tpu.vector_store %arg11[%c0_148, %c0_149], %284 {strides = array<i32>} : memref<2x3xf32, #tpu.memory_space<vmem>>, vector<2x3xf32>,
    return
  }
}

</mosaic_0001>

<bundles_post_ra>
// kernel: lcrs_forward.2
= control target key start
LH: loop header
LB: loop body
LE: loop exit
PB: predicated region body
PF: predicated region fallthrough
CT: control target
= control target key end

     0   :  { %s1899_s0 = inlined_call_operand.vmem [shape: s32[3,2], index: 0, kind: input, shape index: {}]   ;;  %s1900_s1 = inlined_call_operand.vmem [shape: f32[3,16,32], index: 1, kind: input, shape index: {}]   ;;  %s1901_s2 = inlined_call_operand.vmem [shape: f32[3,32,128], index: 2, kind: input, shape index: {}]   ;;  %s1902_s3 = inlined_call_operand.vmem [shape: f32[3,32,128], index: 3, kind: input, shape index: {}]   ;;  %s1903_s4 = inlined_call_operand.vmem [shape: f32[3,1,128], index: 4, kind: input, shape index: {}]   ;;  %s1904_s5 = inlined_call_operand.vmem [shape: f32[3,16,32], index: 5, kind: output, shape index: {}]  }
   0x1   :  { %s10_s20 = sshll.u32 %s1899_s0, 4  ;;  %s11_s20 = int_to_ptr.vmem [resolvable:$true] %s10_s20 }
   0x2   :  { %s1682_s21 = scalar_lea.vmem %s11_s20, 64  ;;  %p1687_p1 = scmp.lt.s32.totalorder %s11_s20, %s11_s20 }
   0x3   :  { %p1683_p0 = scmp.ne.s32.totalorder %s11_s20, %s1682_s21  ;;  %p1688_p2 = scmp.lt.s32.totalorder %s1682_s21, %s1682_s21 }
   0x5   :  { %p1689_p3 = por %p1688_p2, %p1687_p1 }
   0x7   :  { %p1690_p4 = pnand %p1689_p3, %p1683_p0 }
   0x9   :  { %1693 = shalt.err (!%p1690_p4)  }
   0xa   :  { %s1704_s22 = smov [#allocation3]  }
   0xb   :  { %13 = dma.vmem_to_smem %s11_s20, 64, %s1704_s22, [#allocation2] }
   0xc   :  { %1698 = dma.done.wait [#allocation2], 64 }
   0xd   :  { %1699 = vsyncadd [#allocation2], 4294967232 }
   0xe   :  { %15 = sfence }
   0xf   :  { %s1743_s23 = smov 0  }
  0x10 LB: > { %s1749_s0 = sadd.s32 4294967295, %s1702_s23   ;;  %p1367_p5 = scmp.ge.s32.totalorder %s1702_s23, 1  ;;  %s1702_s23 = sphi %s1743_s23, %s21_s23  }
  0x11   : > { %p197_p6 = scmp.lt.s32.totalorder %s1702_s23, 4 }
  0x13   : > { %p198_p7 = pnand %p1367_p5, %p197_p6 }
  0x14   : > { %p236_p8 = scmp.lt.s32.totalorder (!%p198_p7), %s1749_s0, 2  ;;  %v1705_v0 = vmov (!%p198_p7), 0.0|0.0   ;;  %vm1706_vm0 = vmmov (!%p198_p7), 0   ;;  %v1707_v1 = vmov (!%p198_p7), 0.0   ;;  %vm272_vm1 = vcmask (!%p198_p7), 261120   ;;  %s1708_s14 = smov (!%p198_p7), 64  }
  0x15   : > { %201 = sbr.rel (%p198_p7) target bundleno = 5690 (0x163a), region = 36  ;;  %1556 = vmatprep.subr.bf16.mxu1 (!%p198_p7), %v1705_v0  ;;  %1468 = vmatprep.mubr.msk.f32.mxu1 (!%p198_p7), %vm1706_vm0, %v1707_v1  ;;  %s1709_s15 = smov (!%p198_p7), 32   ;;  %vm1217_vm2 = vcmask (!%p198_p7), 1040384   ;;  %vm1219_vm3 = vcmask (!%p198_p7), 1041408   ;;  %vm1221_vm4 = vcmask (!%p198_p7), 1042432   ;;  %vm1223_vm5 = vcmask (!%p198_p7), 1043456  }
  0x16   : > { %vm1225_vm6 = vcmask (!%p198_p7), 1044480   ;;  %vm1227_vm7 = vcmask (!%p198_p7), 1045504   ;;  %s1394_s16 = sshll.u32 (!%p198_p7), %s1749_s0, 7  ;;  %vm1229_vm9 = vcmask (!%p198_p7), 1046528  }
  0x17   : > { %s1263_s17 = sadd.s32 (!%p198_p7), 1, %s1394_s16  ;;  %s1232_s19 = sld [smem:[#allocation3 + %s1394_s16]] (!%p198_p7) }
  0x18   : > { %s1264_s18 = sld [smem:[#allocation3 + %s1263_s17]] (!%p198_p7) }
  0x1c   : > { %s1758_s24 = scalar_select %p236_p8, %s1749_s0, 2 }
  0x1e   : > { %s1400_s25 = sshll.u32 %s1758_s24, 5  ;;  %s1399_s26 = sshll.u32 %s1758_s24, 4 }
  0x1f   : > { %s245_s29 = scalar_lea.vmem %s1901_s2, %s1400_s25  ;;  %s250_s7 = scalar_lea.vmem %s1902_s3, %s1400_s25 }
  0x20   : > { %v261_v2 = vld [vmem:[%s245_s29] sm:$0xff]  ;;  %v262_v3 = vld [vmem:[%s245_s29 + $0x8] sm:$0xff]  ;;  %s240_s10 = scalar_lea.vmem %s1900_s1, %s1399_s26  ;;  %v356_v7 = vld [vmem:[%s250_s7 + $0x10] sm:$0xff]  ;;  %s253_s13 = scalar_lea.vmem %s1903_s4, %s1758_s24 }
  0x21   : > { %v354_v4 = vld [vmem:[%s250_s7] sm:$0xff]  ;;  %v1548_v5 = vpack.c.bf16 %v262_v3, %v261_v2  ;;  %v355_v6 = vld [vmem:[%s250_s7 + $0x8] sm:$0xff]  ;;  %v357_v8 = vld [vmem:[%s250_s7 + $0x18] sm:$0xff]  ;;  %s258_s22 = scalar_lea.vmem %s1904_s5, %s1399_s26 }
  0x22   : > { %v1773_v9 = vpack.c.bf16 %v355_v6, %v354_v4  ;;  %v263_v10 = vld [vmem:[%s245_s29 + $0x10] sm:$0xff]  ;;  %v264_v11 = vld [vmem:[%s245_s29 + $0x18] sm:$0xff]  ;;  %v259_v12 = vld [vmem:[%s240_s10] sm:$0xff]  ;;  %v1776_v14 = vpack.c.bf16 %v357_v8, %v356_v7 }
  0x23   : > { %1549 = vmatprep.subr.bf16.mxu0 %v1548_v5  ;;  %v1552_v13 = vpack.c.bf16 %v264_v11, %v263_v10  ;;  %1457 = vmatprep.mubr.msk.f32.mxu0 %vm272_vm1, %v259_v12  ;;  %v260_v15 = vld [vmem:[%s240_s10 + $0x8] sm:$0xff]  ;;  %v1376_v16 = vld [vmem:[%s253_s13] ss:$0 sm:$0xff] }
  0x24   : > { %1551 = vmatpush3.bf16.msra.mxu0 %v1548_v5  ;;  %1558 = vmatpush3.bf16.msra.mxu1 %v1773_v9 }
  0x25   : > { %1553 = vmatprep.subr.bf16.mxu0 %v1552_v13  ;;  %1559 = vmatprep.subr.bf16.mxu1 %v1705_v0 }
  0x28   : > { %1555 = vmatpush3.bf16.msra.mxu0 %v1552_v13  ;;  %1561 = vmatpush3.bf16.msra.mxu1 %v1776_v14 }
  0x29   : > { %1562 = vmatprep.subr.bf16.mxu0 %v1705_v0  ;;  %1568 = vmatprep.subr.bf16.mxu1 %v1705_v0 }
  0x2b   : > { %1458 = vmatmul.mubr.msk.f32.vlgmr.msra.gmra.mrb[0].mxu0 %vm272_vm1, %v260_v15  ;;  %1469 = vmatmul.mubr.f32.vlgmr.msra.gmra.mrb[0].mxu1 %v1707_v1 }
  0x2c   : > { %1564 = vmatpush3.bf16.msra.mxu0 %v1773_v9  ;;  %1479 = vmatprep.mubr.msk.f32.mxu0 %vm1706_vm0, %v1707_v1 }
  0x2d   : > { %1565 = vmatprep.subr.bf16.mxu0 %v1705_v0  ;;  %1570 = vmatpush3.bf16.msra.mxu1 %v1773_v9 }
  0x2e   : > { %1571 = vmatprep.subr.bf16.mxu1 %v1705_v0  ;;  %1490 = vmatprep.mubr.msk.f32.mxu1 %vm1706_vm0, %v1707_v1 }
  0x30   : > { %1567 = vmatpush3.bf16.msra.mxu0 %v1776_v14 }
  0x31   : > { %1573 = vmatpush3.bf16.msra.mxu1 %v1776_v14  ;;  %1574 = vmatprep.subr.bf16.mxu0 %v1705_v0 }
  0x32   : > { %1580 = vmatprep.subr.bf16.mxu1 %v1705_v0 }
  0xfe   : > { %v1459_v17 = vpop.f32.mrb[0].mxu0  ;;  %v427_v18 = vpop.f32.mrb[0].mxu1 }
  0xff   : > { %v1801_v19 = vadd.f32 %v1459_v17, %v1376_v16  ;;  %v345_v20 = vpop.f32.mrb[1].mxu0  ;;  %v1470_v21 = vpop.f32.mrb[1].mxu1 }
 0x100   : > { %v1803_v22 = vadd.f32 %v1376_v16, %v345_v20 }
 0x102   : > { %v431_v23 = vadd.f32 %v427_v18, %v1803_v22 }
 0x104   : > { %1618 = vtanh.f32 %v431_v23  ;;  %v1379_v25 = vmul.f32 -1.442695, %v431_v23 }
 0x106   : > { %1620 = vpow2.f32 %v1379_v25 }
 0x10e   : > { %v1619_v24 = vpop.eup %1618 }
 0x10f   : > { %441 = vrot.lane.b32.xlu0 %v1619_v24, %s1708_s14 }
 0x110   : > { %v1621_v26 = vpop.eup %1620 }
 0x111   : > { %v435_v27 = vadd.f32 1.0, %v1621_v26 }
 0x113   : > { %1622 = vrcp.f32 %v435_v27 }
 0x11d   : > { %v1623_v28 = vpop.eup %1622 }
 0x11e   : > { %v439_v31 = vmul.f32 0.0, %v1623_v28 }
 0x181   : > { %v442_v29 = vpop.permute.xlu0 %441 }
 0x182   : > { %v444_v30 = vmul.f32 %v1623_v28, %v442_v29 }
 0x184   : > { %446 = vrot.lane.b32.xlu0 %v444_v30, %s1709_s15 }
 0x1f6   : > { %v447_v32 = vpop.permute.xlu0 %446 }
 0x1f7   : > { %v449_v33 = vadd.f32 %v447_v32, %v439_v31 }
 0x1f9   : > { %1624 = vtanh.f32 %v449_v33  ;;  %v543_v49 = vrot.slane %v449_v33, 6 }
 0x203   : > { %v1625_v34 = vpop.eup %1624 }
 0x204   : > { %452 = vrot.lane.b32.xlu1 %v1625_v34, %s1708_s14 }
 0x276   : > { %v453_v35 = vpop.permute.xlu1 %452 }
 0x277   : > { %v1809_v36 = vmul.f32 %v1623_v28, %v453_v35 }
 0x279   : > { %457 = vrot.lane.b32.xlu1 %v1809_v36, %s1709_s15  ;;  %v1243_v17 = vrot.slane %v1809_v36, 1 }
 0x2eb   : > { %v458_v37 = vpop.permute.xlu1 %457 }
 0x2ec   : > { %1480 = vmatmul.mubr.msk.f32.vlgmr.msra.gmra.mrb[2].mxu0 %vm272_vm1, %v458_v37 }
 0x2ed   : > { %1576 = vmatpush3.bf16.msra.mxu0 %v1773_v9  ;;  %1501 = vmatprep.mubr.msk.f32.mxu0 %vm1706_vm0, %v1707_v1 }
 0x2ee   : > { %1577 = vmatprep.subr.bf16.mxu0 %v1705_v0 }
 0x2f1   : > { %1579 = vmatpush3.bf16.msra.mxu0 %v1776_v14 }
 0x2f2   : > { %1586 = vmatprep.subr.bf16.mxu0 %v1705_v0 }
 0x3bf   : > { %v527_v38 = vpop.f32.mrb[2].mxu0 }
 0x3c0   : > { %v532_v39 = vrot.slane %v527_v38, 6  ;;  %v1481_v40 = vpop.f32.mrb[3].mxu0 }
 0x3c2   : > { %v534_v41 = vadd.f32 %v532_v39, %v1803_v22 }
 0x3c4   : > { %1626 = vtanh.f32 %v534_v41  ;;  %v1381_v43 = vmul.f32 -1.442695, %v534_v41 }
 0x3c6   : > { %1628 = vpow2.f32 %v1381_v43 }
 0x3ce   : > { %v1627_v42 = vpop.eup %1626 }
 0x3cf   : > { %547 = vrot.lane.b32.xlu0 %v1627_v42, %s1708_s14 }
 0x3d0   : > { %v1629_v44 = vpop.eup %1628 }
 0x3d1   : > { %v538_v45 = vadd.f32 1.0, %v1629_v44 }
 0x3d3   : > { %1630 = vrcp.f32 %v538_v45 }
 0x3dd   : > { %v1631_v46 = vpop.eup %1630 }
 0x3de   : > { %v545_v50 = vmul.f32 %v1631_v46, %v543_v49 }
 0x441   : > { %v548_v47 = vpop.permute.xlu0 %547 }
 0x442   : > { %v550_v48 = vmul.f32 %v1631_v46, %v548_v47 }
 0x444   : > { %552 = vrot.lane.b32.xlu1 %v550_v48, %s1709_s15 }
 0x4b6   : > { %v553_v51 = vpop.permute.xlu1 %552 }
 0x4b7   : > { %v555_v52 = vadd.f32 %v553_v51, %v545_v50 }
 0x4b9   : > { %1632 = vtanh.f32 %v555_v52  ;;  %v650_v7 = vrot.slane %v555_v52, 6 }
 0x4c3   : > { %v1633_v53 = vpop.eup %1632 }
 0x4c4   : > { %558 = vrot.lane.b32.xlu0 %v1633_v53, %s1708_s14 }
 0x536   : > { %v559_v54 = vpop.permute.xlu0 %558 }
 0x537   : > { %v561_v55 = vmul.f32 %v1631_v46, %v559_v54 }
 0x539   : > { %v563_v56 = vrot.slane %v561_v55, 2  ;;  %v1202_v13 = vrot.slane %v561_v55, 1 }
 0x53b   : > { %564 = vrot.lane.b32.xlu1 %v563_v56, %s1709_s15  ;;  %v1218_v23 = vsel %vm1217_vm2, %v1809_v36, %v1202_v13  ;;  %v1256_v24 = vsel %vm1217_vm2, %v1243_v17, %v563_v56 }
 0x5ad   : > { %v565_v57 = vpop.permute.xlu1 %564 }
 0x5ae   : > { %1491 = vmatmul.mubr.msk.f32.vlgmr.msra.gmra.mrb[2].mxu1 %vm272_vm1, %v565_v57 }
 0x5af   : > { %1582 = vmatpush3.bf16.msra.mxu1 %v1773_v9  ;;  %1512 = vmatprep.mubr.msk.f32.mxu1 %vm1706_vm0, %v1707_v1 }
 0x5b0   : > { %1583 = vmatprep.subr.bf16.mxu1 %v1705_v0 }
 0x5b3   : > { %1585 = vmatpush3.bf16.msra.mxu1 %v1776_v14 }
 0x5b4   : > { %1592 = vmatprep.subr.bf16.mxu1 %v1705_v0 }
 0x681   : > { %v634_v58 = vpop.f32.mrb[2].mxu1 }
 0x682   : > { %v639_v59 = vrot.slane %v634_v58, 4  ;;  %v1492_v60 = vpop.f32.mrb[3].mxu1 }
 0x684   : > { %v641_v61 = vadd.f32 %v639_v59, %v1803_v22 }
 0x686   : > { %1634 = vtanh.f32 %v641_v61  ;;  %v1383_v63 = vmul.f32 -1.442695, %v641_v61 }
 0x688   : > { %1636 = vpow2.f32 %v1383_v63 }
 0x690   : > { %v1635_v62 = vpop.eup %1634 }
 0x691   : > { %654 = vrot.lane.b32.xlu0 %v1635_v62, %s1708_s14 }
 0x692   : > { %v1637_v2 = vpop.eup %1636 }
 0x693   : > { %v645_v3 = vadd.f32 1.0, %v1637_v2 }
 0x695   : > { %1638 = vrcp.f32 %v645_v3 }
 0x69f   : > { %v1639_v4 = vpop.eup %1638 }
 0x6a0   : > { %v652_v8 = vmul.f32 %v1639_v4, %v650_v7 }
 0x703   : > { %v655_v5 = vpop.permute.xlu0 %654 }
 0x704   : > { %v657_v6 = vmul.f32 %v1639_v4, %v655_v5 }
 0x706   : > { %659 = vrot.lane.b32.xlu1 %v657_v6, %s1709_s15 }
 0x778   : > { %v660_v10 = vpop.permute.xlu1 %659 }
 0x779   : > { %v662_v11 = vadd.f32 %v660_v10, %v652_v8 }
 0x77b   : > { %1640 = vtanh.f32 %v662_v11  ;;  %v757_v39 = vrot.slane %v662_v11, 6 }
 0x785   : > { %v1641_v12 = vpop.eup %1640 }
 0x786   : > { %665 = vrot.lane.b32.xlu0 %v1641_v12, %s1708_s14 }
 0x7f8   : > { %v666_v15 = vpop.permute.xlu0 %665 }
 0x7f9   : > { %v668_v16 = vmul.f32 %v1639_v4, %v666_v15 }
 0x7fb   : > { %v1204_v18 = vrot.slane %v668_v16, 2  ;;  %v1246_v20 = vrot.slane %v668_v16, 3  ;;  %v670_v21 = vrot.slane %v668_v16, 4 }
 0x7fd   : > { %v1220_v25 = vsel %vm1219_vm3, %v1218_v23, %v1204_v18  ;;  %v1257_v26 = vsel %vm1219_vm3, %v1256_v24, %v1246_v20  ;;  %671 = vrot.lane.b32.xlu1 %v670_v21, %s1709_s15 }
 0x86f   : > { %v672_v27 = vpop.permute.xlu1 %671 }
 0x870   : > { %1502 = vmatmul.mubr.msk.f32.vlgmr.msra.gmra.mrb[4].mxu0 %vm272_vm1, %v672_v27 }
 0x871   : > { %1588 = vmatpush3.bf16.msra.mxu0 %v1773_v9  ;;  %1523 = vmatprep.mubr.msk.f32.mxu0 %vm1706_vm0, %v1707_v1 }
 0x872   : > { %1589 = vmatprep.subr.bf16.mxu0 %v1705_v0 }
 0x875   : > { %1591 = vmatpush3.bf16.msra.mxu0 %v1776_v14 }
 0x876   : > { %1598 = vmatprep.subr.bf16.mxu0 %v1705_v0 }
 0x943   : > { %v741_v28 = vpop.f32.mrb[4].mxu0 }
 0x944   : > { %v746_v29 = vrot.slane %v741_v28, 2  ;;  %v1503_v30 = vpop.f32.mrb[5].mxu0 }
 0x946   : > { %v748_v31 = vadd.f32 %v746_v29, %v1803_v22 }
 0x948   : > { %1642 = vtanh.f32 %v748_v31  ;;  %v1385_v33 = vmul.f32 -1.442695, %v748_v31 }
 0x94a   : > { %1644 = vpow2.f32 %v1385_v33 }
 0x952   : > { %v1643_v32 = vpop.eup %1642 }
 0x953   : > { %761 = vrot.lane.b32.xlu0 %v1643_v32, %s1708_s14 }
 0x954   : > { %v1645_v34 = vpop.eup %1644 }
 0x955   : > { %v752_v35 = vadd.f32 1.0, %v1645_v34 }
 0x957   : > { %1646 = vrcp.f32 %v752_v35 }
 0x961   : > { %v1647_v36 = vpop.eup %1646 }
 0x962   : > { %v759_v40 = vmul.f32 %v1647_v36, %v757_v39 }
 0x9c5   : > { %v762_v37 = vpop.permute.xlu0 %761 }
 0x9c6   : > { %v764_v38 = vmul.f32 %v1647_v36, %v762_v37 }
 0x9c8   : > { %766 = vrot.lane.b32.xlu1 %v764_v38, %s1709_s15 }
 0xa3a   : > { %v767_v41 = vpop.permute.xlu1 %766 }
 0xa3b   : > { %v769_v42 = vadd.f32 %v767_v41, %v759_v40 }
 0xa3d   : > { %1648 = vtanh.f32 %v769_v42  ;;  %v861_v61 = vrot.slane %v769_v42, 6 }
 0xa47   : > { %v1649_v22 = vpop.eup %1648 }
 0xa48   : > { %772 = vrot.lane.b32.xlu0 %v1649_v22, %s1708_s14 }
 0xaba   : > { %v773_v43 = vpop.permute.xlu0 %772 }
 0xabb   : > { %v775_v44 = vmul.f32 %v1647_v36, %v773_v43 }
 0xabd   : > { %v1206_v45 = vrot.slane %v775_v44, 3  ;;  %v1248_v46 = vrot.slane %v775_v44, 4  ;;  %v777_v47 = vrot.slane %v775_v44, 6 }
 0xabf   : > { %v1222_v48 = vsel %vm1221_vm4, %v1220_v25, %v1206_v45  ;;  %v1258_v49 = vsel %vm1221_vm4, %v1257_v26, %v1248_v46  ;;  %778 = vrot.lane.b32.xlu1 %v777_v47, %s1709_s15 }
 0xb31   : > { %v779_v50 = vpop.permute.xlu1 %778 }
 0xb32   : > { %1513 = vmatmul.mubr.msk.f32.vlgmr.msra.gmra.mrb[4].mxu1 %vm272_vm1, %v779_v50 }
 0xb33   : > { %1594 = vmatpush3.bf16.msra.mxu1 %v1773_v9  ;;  %1534 = vmatprep.mubr.msk.f32.mxu1 %vm1706_vm0, %v1707_v1 }
 0xb34   : > { %1595 = vmatprep.subr.bf16.mxu1 %v1705_v0 }
 0xb37   : > { %1597 = vmatpush3.bf16.msra.mxu1 %v1776_v14 }
 0xc05   : > { %v848_v51 = vpop.f32.mrb[4].mxu1 }
 0xc06   : > { %v852_v52 = vadd.f32 %v848_v51, %v1801_v19  ;;  %v1514_v53 = vpop.f32.mrb[5].mxu1 }
 0xc08   : > { %1650 = vtanh.f32 %v852_v52  ;;  %v1387_v55 = vmul.f32 -1.442695, %v852_v52 }
 0xc0a   : > { %1652 = vpow2.f32 %v1387_v55 }
 0xc12   : > { %v1651_v54 = vpop.eup %1650 }
 0xc13   : > { %865 = vrot.lane.b32.xlu0 %v1651_v54, %s1708_s14 }
 0xc14   : > { %v1653_v56 = vpop.eup %1652 }
 0xc15   : > { %v856_v57 = vadd.f32 1.0, %v1653_v56 }
 0xc17   : > { %1654 = vrcp.f32 %v856_v57 }
 0xc21   : > { %v1655_v58 = vpop.eup %1654 }
 0xc22   : > { %v863_v62 = vmul.f32 %v1655_v58, %v861_v61 }
 0xc85   : > { %v866_v59 = vpop.permute.xlu0 %865 }
 0xc86   : > { %v868_v60 = vmul.f32 %v1655_v58, %v866_v59 }
 0xc88   : > { %870 = vrot.lane.b32.xlu1 %v868_v60, %s1709_s15 }
 0xcfa   : > { %v871_v63 = vpop.permute.xlu1 %870 }
 0xcfb   : > { %v873_v2 = vadd.f32 %v871_v63, %v863_v62 }
 0xcfd   : > { %1656 = vtanh.f32 %v873_v2 }
 0xd07   : > { %v1657_v3 = vpop.eup %1656 }
 0xd08   : > { %876 = vrot.lane.b32.xlu0 %v1657_v3, %s1708_s14 }
 0xd7a   : > { %v877_v4 = vpop.permute.xlu0 %876 }
 0xd7b   : > { %v879_v5 = vmul.f32 %v1655_v58, %v877_v4 }
 0xd7d   : > { %v1208_v6 = vrot.slane %v879_v5, 4  ;;  %v1250_v7 = vrot.slane %v879_v5, 5  ;;  %881 = vrot.lane.b32.xlu1 %v879_v5, %s1709_s15 }
 0xd7f   : > { %v1224_v8 = vsel %vm1223_vm5, %v1222_v48, %v1208_v6  ;;  %v1259_v10 = vsel %vm1223_vm5, %v1258_v49, %v1250_v7 }
 0xdef   : > { %v882_v11 = vpop.permute.xlu1 %881 }
 0xdf0   : > { %1524 = vmatmul.mubr.msk.f32.vlgmr.msra.gmra.mrb[6].mxu0 %vm272_vm1, %v882_v11 }
 0xdf1   : > { %1600 = vmatpush3.bf16.msra.mxu0 %v1773_v9  ;;  %1545 = vmatprep.mubr.msk.f32.mxu0 %vm1706_vm0, %v1707_v1 }
 0xdf2   : > { %1601 = vmatprep.subr.bf16.mxu0 %v1705_v0  ;;  %v967_v0 = vrot.slane %v873_v2, 6 }
 0xdf5   : > { %1603 = vmatpush3.bf16.msra.mxu0 %v1776_v14 }
 0xec3   : > { %v951_v12 = vpop.f32.mrb[6].mxu0 }
 0xec4   : > { %v956_v13 = vrot.slane %v951_v12, 6  ;;  %v1525_v15 = vpop.f32.mrb[7].mxu0 }
 0xec6   : > { %v958_v16 = vadd.f32 %v956_v13, %v1801_v19  ;;  %v1200_v13 = vlaneseq }
 0xec8   : > { %1658 = vtanh.f32 %v958_v16  ;;  %v1389_v18 = vmul.f32 -1.442695, %v958_v16  ;;  %v1201_v15 = vshrl.u32 %v1200_v13, 7  ;;  %v1265_v16 = vstv %s1264_s18 }
 0xeca   : > { %1660 = vpow2.f32 %v1389_v18  ;;  %vm1266_vm8 = vcmp.lt.s32.totalorder %v1201_v15, %v1265_v16 }
 0xed2   : > { %v1659_v17 = vpop.eup %1658 }
 0xed3   : > { %971 = vrot.lane.b32.xlu0 %v1659_v17, %s1708_s14  ;;  %v1233_v17 = vstv %s1232_s19 }
 0xed4   : > { %v1661_v20 = vpop.eup %1660  ;;  %vm1234_vm10 = vcmp.lt.s32.totalorder %v1201_v15, %v1233_v17 }
 0xed5   : > { %v962_v9 = vadd.f32 1.0, %v1661_v20 }
 0xed7   : > { %1662 = vrcp.f32 %v962_v9  ;;  %v1396_v9 = vsel %vm1266_vm8, 1.0, %v1707_v1 }
 0xee1   : > { %v1663_v21 = vpop.eup %1662 }
 0xee2   : > { %v969_v14 = vmul.f32 %v1663_v21, %v967_v0 }
 0xf45   : > { %v972_v23 = vpop.permute.xlu0 %971 }
 0xf46   : > { %v974_v24 = vmul.f32 %v1663_v21, %v972_v23 }
 0xf48   : > { %976 = vrot.lane.b32.xlu1 %v974_v24, %s1709_s15  ;;  %v1395_v24 = vsel %vm1234_vm10, 1.0, %v1707_v1 }
 0xfba   : > { %v977_v25 = vpop.permute.xlu1 %976 }
 0xfbb   : > { %v979_v26 = vadd.f32 %v977_v25, %v969_v14 }
 0xfbd   : > { %1664 = vtanh.f32 %v979_v26  ;;  %v1074_v46 = vrot.slane %v979_v26, 6 }
 0xfc7   : > { %v1665_v27 = vpop.eup %1664 }
 0xfc8   : > { %982 = vrot.lane.b32.xlu0 %v1665_v27, %s1708_s14 }
0x103a   : > { %v983_v28 = vpop.permute.xlu0 %982 }
0x103b   : > { %v985_v29 = vmul.f32 %v1663_v21, %v983_v28 }
0x103d   : > { %v1210_v30 = vrot.slane %v985_v29, 5  ;;  %v1252_v31 = vrot.slane %v985_v29, 6  ;;  %v987_v32 = vrot.slane %v985_v29, 2 }
0x103f   : > { %988 = vrot.lane.b32.xlu1 %v987_v32, %s1709_s15  ;;  %v1260_v33 = vsel %vm1225_vm6, %v1259_v10, %v1252_v31  ;;  %v1226_v34 = vsel %vm1225_vm6, %v1224_v8, %v1210_v30 }
0x10b1   : > { %v989_v35 = vpop.permute.xlu1 %988 }
0x10b2   : > { %1535 = vmatmul.mubr.msk.f32.vlgmr.msra.gmra.mrb[6].mxu1 %vm272_vm1, %v989_v35 }
0x1185   : > { %v1058_v36 = vpop.f32.mrb[6].mxu1 }
0x1186   : > { %v1063_v37 = vrot.slane %v1058_v36, 4  ;;  %v1536_v38 = vpop.f32.mrb[7].mxu1 }
0x1188   : > { %v1065_v39 = vadd.f32 %v1063_v37, %v1801_v19 }
0x118a   : > { %1666 = vtanh.f32 %v1065_v39  ;;  %v1391_v41 = vmul.f32 -1.442695, %v1065_v39 }
0x118c   : > { %1668 = vpow2.f32 %v1391_v41 }
0x1194   : > { %v1667_v40 = vpop.eup %1666 }
0x1195   : > { %1078 = vrot.lane.b32.xlu0 %v1667_v40, %s1708_s14 }
0x1196   : > { %v1669_v42 = vpop.eup %1668 }
0x1197   : > { %v1069_v22 = vadd.f32 1.0, %v1669_v42 }
0x1199   : > { %1670 = vrcp.f32 %v1069_v22 }
0x11a3   : > { %v1671_v43 = vpop.eup %1670 }
0x11a4   : > { %v1076_v47 = vmul.f32 %v1671_v43, %v1074_v46 }
0x1207   : > { %v1079_v44 = vpop.permute.xlu0 %1078 }
0x1208   : > { %v1081_v45 = vmul.f32 %v1671_v43, %v1079_v44 }
0x120a   : > { %1083 = vrot.lane.b32.xlu1 %v1081_v45, %s1709_s15 }
0x127c   : > { %v1084_v48 = vpop.permute.xlu1 %1083 }
0x127d   : > { %v1086_v49 = vadd.f32 %v1084_v48, %v1076_v47 }
0x127f   : > { %1672 = vtanh.f32 %v1086_v49  ;;  %v1181_v8 = vrot.slane %v1086_v49, 6 }
0x1289   : > { %v1673_v50 = vpop.eup %1672 }
0x128a   : > { %1089 = vrot.lane.b32.xlu0 %v1673_v50, %s1708_s14 }
0x12fc   : > { %v1090_v51 = vpop.permute.xlu0 %1089 }
0x12fd   : > { %v1092_v52 = vmul.f32 %v1671_v43, %v1090_v51 }
0x12ff   : > { %v1212_v53 = vrot.slane %v1092_v52, 6  ;;  %v1254_v54 = vrot.slane %v1092_v52, 7  ;;  %v1094_v55 = vrot.slane %v1092_v52, 4 }
0x1301   : > { %1095 = vrot.lane.b32.xlu1 %v1094_v55, %s1709_s15  ;;  %v1261_v56 = vsel %vm1227_vm7, %v1260_v33, %v1254_v54  ;;  %v1228_v57 = vsel %vm1227_vm7, %v1226_v34, %v1212_v53 }
0x1373   : > { %v1096_v58 = vpop.permute.xlu1 %1095 }
0x1374   : > { %1546 = vmatmul.mubr.msk.f32.vlgmr.msra.gmra.mrb[8].mxu0 %vm272_vm1, %v1096_v58 }
0x1447   : > { %v1165_v59 = vpop.f32.mrb[8].mxu0 }
0x1448   : > { %v1170_v60 = vrot.slane %v1165_v59, 2  ;;  %v1547_v61 = vpop.f32.mrb[9].mxu0 }
0x144a   : > { %v1172_v62 = vadd.f32 %v1170_v60, %v1801_v19 }
0x144c   : > { %1674 = vtanh.f32 %v1172_v62  ;;  %v1393_v2 = vmul.f32 -1.442695, %v1172_v62 }
0x144e   : > { %1676 = vpow2.f32 %v1393_v2 }
0x1456   : > { %v1675_v63 = vpop.eup %1674 }
0x1457   : > { %1185 = vrot.lane.b32.xlu0 %v1675_v63, %s1708_s14 }
0x1458   : > { %v1677_v3 = vpop.eup %1676 }
0x1459   : > { %v1176_v4 = vadd.f32 1.0, %v1677_v3 }
0x145b   : > { %1678 = vrcp.f32 %v1176_v4 }
0x1465   : > { %v1679_v5 = vpop.eup %1678 }
0x1466   : > { %v1183_v10 = vmul.f32 %v1679_v5, %v1181_v8 }
0x14c9   : > { %v1186_v6 = vpop.permute.xlu0 %1185 }
0x14ca   : > { %v1188_v7 = vmul.f32 %v1679_v5, %v1186_v6 }
0x14cc   : > { %1190 = vrot.lane.b32.xlu1 %v1188_v7, %s1709_s15 }
0x153e   : > { %v1191_v11 = vpop.permute.xlu1 %1190 }
0x153f   : > { %v1193_v12 = vadd.f32 %v1191_v11, %v1183_v10 }
0x1541   : > { %1680 = vtanh.f32 %v1193_v12 }
0x154b   : > { %v1681_v19 = vpop.eup %1680 }
0x154c   : > { %1196 = vrot.lane.b32.xlu0 %v1681_v19, %s1708_s14 }
0x15be   : > { %v1197_v18 = vpop.permute.xlu0 %1196 }
0x15bf   : > { %v1199_v20 = vmul.f32 %v1679_v5, %v1197_v18 }
0x15c1   : > { %v1215_v21 = vrot.slane %v1199_v20, 7  ;;  %v1262_v23 = vsel %vm1229_vm9, %v1261_v56, %v1199_v20 }
0x15c2   : > { %v1269_v0 = vmul.f32 %v1396_v9, %v1262_v23 }
0x15c3   : > { %v1230_v14 = vsel %vm1229_vm9, %v1228_v57, %v1215_v21 }
0x15c4   : > { %1271 = vrot.lane.b32.xlu0 %v1269_v0, %s1709_s15  ;;  %v1237_v25 = vmul.f32 %v1395_v24, %v1230_v14 }
0x15c6   : > { %1239 = vrot.lane.b32.xlu1 %v1237_v25, %s1709_s15 }
0x1636   : > { %v1272_v26 = vpop.permute.xlu0 %1271 }
0x1637   : > { %1274 = vst.msk [vmem:[%s258_s22 + $0x8] sm:$0xff] %vm272_vm1, %v1272_v26 }
0x1638   : > { %v1240_v27 = vpop.permute.xlu1 %1239 }
0x1639   : > { %1242 = vst.msk [vmem:[%s258_s22] sm:$0xff] %vm272_vm1, %v1240_v27 }
0x163a PF: > { %s21_s23 = sadd.s32 1, %s1702_s23  }
0x163b   : > { %p18_p9 = scmp.ge.s32.totalorder %s21_s23, 5  }
0x163d   :  { %20 = sbr.rel (!%p18_p9) target bundleno = 16 (0x10), region = 75 }

// kernel: lcrs_forward.3
= control target key start
LH: loop header
LB: loop body
LE: loop exit
PB: predicated region body
PF: predicated region fallthrough
CT: control target
= control target key end

     0   :  { %v2438_v3 = vmov 0   ;;  %vm47_vm0 = vcmask 261120   ;;  %s2991_s0 = inlined_call_operand.vmem [shape: f32[3,16,32], index: 0, kind: input, shape index: {}]   ;;  %s2992_s1 = inlined_call_operand.vmem [shape: f32[2,1], index: 1, kind: input, shape index: {}]   ;;  %s2993_s2 = inlined_call_operand.vmem [shape: f32[4,32,32], index: 2, kind: input, shape index: {}]   ;;  %s2994_s3 = inlined_call_operand.vmem [shape: f32[4,1,32], index: 3, kind: input, shape index: {}]   ;;  %s2995_s4 = inlined_call_operand.vmem [shape: f32[4,32,32], index: 4, kind: input, shape index: {}]   ;;  %s2996_s5 = inlined_call_operand.vmem [shape: f32[4,1,32], index: 5, kind: input, shape index: {}]   ;;  %s2997_s6 = inlined_call_operand.vmem [shape: f32[4,32,32], index: 6, kind: input, shape index: {}]   ;;  %s2998_s7 = inlined_call_operand.vmem [shape: f32[4,32,32], index: 7, kind: input, shape index: {}]   ;;  %s2999_s8 = inlined_call_operand.vmem [shape: f32[4,1,32], index: 8, kind: input, shape index: {}]   ;;  %s3000_s9 = inlined_call_operand.vmem [shape: f32[128,3], index: 9, kind: input, shape index: {}]   ;;  %s3001_s10 = inlined_call_operand.vmem [shape: f32[1,3], index: 10, kind: input, shape index: {}]   ;;  %s3002_s11 = inlined_call_operand.hbm [shape: f32[2,3], index: 11, kind: output, shape index: {}]  }
   0x1   :  { %v64_v0 = vld [vmem:[%s2992_s1] sm:$0x3]  ;;  %v72_v2 = vld [vmem:[%s2993_s2 + $0x8] sm:$0xff]  ;;  %2377 = vset.pattern.permute.xlu0 %v2438_v3  ;;  %v73_v5 = vld [vmem:[%s2993_s2 + $0x10] sm:$0xff] }
   0x2   :  { %v71_v1 = vld [vmem:[%s2993_s2] sm:$0xff]  ;;  %v74_v6 = vld [vmem:[%s2993_s2 + $0x18] sm:$0xff]  ;;  %67 = vperm.xlu0 %2377, %v64_v0  }
   0x3   :  { %v2241_v4 = vpack.c.bf16 %v72_v2, %v71_v1  ;;  %v39_v7 = vld [vmem:[%s2991_s0] sm:$0xff]  ;;  %v2245_v8 = vpack.c.bf16 %v74_v6, %v73_v5 }
   0x4   :  { %2038 = vmatprep.mubr.msk.f32.mxu1 %vm47_vm0, %v39_v7 }
   0x5   :  { %2242 = vmatprep.subr.bf16.mxu1 %v2241_v4 }
   0x6   :  { %2244 = vmatpush3.bf16.msra.mxu1 %v2241_v4 }
   0x7   :  { %16 = vsyncpa [#allocation3], 0  ;;  %2246 = vmatprep.subr.bf16.mxu1 %v2245_v8  ;;  %v163_v9 = vld [vmem:[%s2995_s4] sm:$0xff]  ;;  %v164_v10 = vld [vmem:[%s2995_s4 + $0x8] sm:$0xff]  ;;  %v2439_v13 = vmov 0.0|0.0   ;;  %vm2440_vm1 = vmmov 0   ;;  %v324_v49 = vlaneseq }
   0x8   :  { %v40_v11 = vld [vmem:[%s2991_s0 + $0x8] sm:$0xff]  ;;  %v2250_v12 = vpack.c.bf16 %v164_v10, %v163_v9  ;;  %v165_v14 = vld [vmem:[%s2995_s4 + $0x10] sm:$0xff]  ;;  %v166_v15 = vld [vmem:[%s2995_s4 + $0x18] sm:$0xff]  ;;  %v2441_v17 = vmov 0.0   ;;  %vm62_vm2 = vcmask 1040384   ;;  %s2442_s24 = smov 32  }
   0x9   :  { %v2253_v16 = vpack.c.bf16 %v166_v15, %v165_v14  ;;  %v2549_v18 = vld [vmem:[%s2991_s0 + $0x10] sm:$0xff]  ;;  %v2554_v19 = vld [vmem:[%s2991_s0 + $0x18] sm:$0xff]  ;;  %v247_v34 = vld [vmem:[%s2997_s6] sm:$0xff]  ;;  %v325_v50 = vshrl.u32 %v324_v49, 7  ;;  %s2443_s25 = smov 96   ;;  %s2444_s17 = smov 64  }
   0xa   :  { %2248 = vmatpush3.bf16.msra.mxu1 %v2245_v8  ;;  %v48_v20 = vsel %vm47_vm0, %v2549_v18, 0.0  ;;  %v55_v21 = vsel %vm47_vm0, %v2554_v19, 0.0  ;;  %v248_v35 = vld [vmem:[%s2997_s6 + $0x8] sm:$0xff]  ;;  %v249_v40 = vld [vmem:[%s2997_s6 + $0x10] sm:$0xff]  ;;  %v250_v41 = vld [vmem:[%s2997_s6 + $0x18] sm:$0xff]  ;;  %vm1711_vm3 = vcmask 523264  }
   0xb   :  { %2249 = vmatprep.subr.bf16.mxu1 %v2439_v13  ;;  %v49_v22 = vrot.slane %v48_v20, 4  ;;  %v56_v23 = vrot.slane %v55_v21, 4  ;;  %v2256_v38 = vpack.c.bf16 %v248_v35, %v247_v34  ;;  %v2259_v42 = vpack.c.bf16 %v250_v41, %v249_v40  ;;  %v1842_v45 = vld [vmem:[%s2996_s5] ss:$0 sm:$0xff]  ;;  %v392_v1 = vld [vmem:[%s2998_s7 + $0x8] sm:$0xff]  ;;  %v393_v2 = vld [vmem:[%s2998_s7 + $0x10] sm:$0xff] }
   0xc   :  { %v2587_v51 = vsub.s32 0, %v325_v50  ;;  %v2589_v52 = vsub.s32 1, %v325_v50  ;;  %v1839_v53 = vld [vmem:[%s2994_s3] ss:$0 sm:$0xff]  ;;  %v394_v4 = vld [vmem:[%s2998_s7 + $0x18] sm:$0xff]  ;;  %v1848_v7 = vld [vmem:[%s2993_s2 + $0x28] sm:$0xff] }
   0xd   :  { %2039 = vmatmul.mubr.msk.f32.vlgmr.msra.gmra.mrb[0].mxu1 %vm47_vm0, %v40_v11  ;;  %v50_v24 = vadd.f32 %v49_v22, %v48_v20  ;;  %v57_v25 = vadd.f32 %v56_v23, %v55_v21  ;;  %v391_v0 = vld [vmem:[%s2998_s7] sm:$0xff]  ;;  %v2265_v5 = vpack.c.bf16 %v394_v4, %v393_v2  ;;  %v1849_v8 = vld [vmem:[%s2993_s2 + $0x30] sm:$0xff]  ;;  %v1850_v10 = vld [vmem:[%s2993_s2 + $0x38] sm:$0xff]  ;;  %vm1713_vm4 = vcmask 785408  }
   0xe   :  { %2251 = vmatpush3.bf16.msra.mxu1 %v2250_v12  ;;  %2049 = vmatprep.mubr.msk.f32.mxu1 %vm2440_vm1, %v2441_v17  ;;  %v2262_v3 = vpack.c.bf16 %v392_v1, %v391_v0  ;;  %v1847_v6 = vld [vmem:[%s2993_s2 + $0x20] sm:$0xff]  ;;  %v2271_v11 = vpack.c.bf16 %v1850_v10, %v1849_v8  ;;  %v1857_v10 = vld [vmem:[%s2995_s4 + $0x30] sm:$0xff]  ;;  %vm1808_vm5 = vcmask 17408  }
   0xf   :  { %2252 = vmatprep.subr.bf16.mxu1 %v2439_v13  ;;  %v51_v26 = vrot.slane %v50_v24, 2  ;;  %v58_v27 = vrot.slane %v57_v25, 2  ;;  %v2267_v9 = vpack.c.bf16 %v1848_v7, %v1847_v6  ;;  %v1855_v6 = vld [vmem:[%s2995_s4 + $0x20] sm:$0xff] }
  0x11   :  { %v52_v28 = vadd.f32 %v51_v26, %v50_v24  ;;  %v59_v29 = vadd.f32 %v58_v27, %v57_v25  ;;  %2268 = vmatprep.subr.bf16.mxu0 %v2267_v9 }
  0x12   :  { %2254 = vmatpush3.bf16.msra.mxu1 %v2253_v16  ;;  %2270 = vmatpush3.bf16.msra.mxu0 %v2267_v9 }
  0x13   :  { %2255 = vmatprep.subr.bf16.mxu1 %v2439_v13  ;;  %v53_v30 = vrot.slane %v52_v28, 1  ;;  %v60_v31 = vrot.slane %v59_v29, 1  ;;  %2272 = vmatprep.subr.bf16.mxu0 %v2271_v11 }
  0x15   :  { %v54_v32 = vadd.f32 %v53_v30, %v52_v28  ;;  %v61_v33 = vadd.f32 %v60_v31, %v59_v29 }
  0x16   :  { %2274 = vmatpush3.bf16.msra.mxu0 %v2271_v11  ;;  %v1858_v11 = vld [vmem:[%s2995_s4 + $0x38] sm:$0xff] }
  0x17   :  { %v63_v36 = vsel %vm62_vm2, %v54_v32, %v61_v33  ;;  %2281 = vmatprep.subr.bf16.mxu0 %v2439_v13 }
  0x81   :  { %v68_v37 = vpop.permute.xlu0 %67 }
  0x82   :  { %v2567_v39 = vmul.f32 %v68_v37, %v63_v36 }
  0x84   :  { %2050 = vmatmul.mubr.msk.f32.vlgmr.msra.gmra.mrb[2].mxu1 %vm47_vm0, %v2567_v39 }
  0x85   :  { %2257 = vmatpush3.bf16.msra.mxu1 %v2256_v38  ;;  %2060 = vmatprep.mubr.msk.f32.mxu1 %vm2440_vm1, %v2441_v17 }
  0x86   :  { %2258 = vmatprep.subr.bf16.mxu1 %v2439_v13 }
  0x89   :  { %2260 = vmatpush3.bf16.msra.mxu1 %v2259_v42 }
  0x8a   :  { %2261 = vmatprep.subr.bf16.mxu1 %v2439_v13 }
  0xe0   :  { %v2040_v43 = vpop.f32.mrb[0].mxu1 }
  0xe1   :  { %v154_v44 = vpop.f32.mrb[1].mxu1  ;;  %v2594_v55 = vadd.f32 %v2040_v43, %v1839_v53 }
  0xe2   :  { %v2596_v56 = vadd.f32 %v1839_v53, %v154_v44 }
 0x157   :  { %v243_v46 = vpop.f32.mrb[2].mxu1 }
 0x158   :  { %v244_v47 = vadd.f32 %v1842_v45, %v243_v46  ;;  %v2051_v48 = vpop.f32.mrb[3].mxu1 }
 0x15a   :  { %2061 = vmatmul.mubr.msk.f32.vlgmr.msra.gmra.mrb[4].mxu1 %vm47_vm0, %v244_v47 }
 0x15b   :  { %2071 = vmatprep.mubr.msk.f32.mxu1 %vm2440_vm1, %v2441_v17  ;;  %2263 = vmatpush3.bf16.msra.mxu1 %v2262_v3 }
 0x15c   :  { %2264 = vmatprep.subr.bf16.mxu1 %v2439_v13 }
 0x15f   :  { %2266 = vmatpush3.bf16.msra.mxu1 %v2265_v5 }
 0x160   :  { %2275 = vmatprep.subr.bf16.mxu1 %v2439_v13 }
 0x22d   :  { %v320_v54 = vpop.f32.mrb[4].mxu1 }
 0x22e   :  { %v327_v57 = vrot.slane %v320_v54, %v2587_v51  ;;  %v360_v58 = vrot.slane %v320_v54, %v2589_v52  ;;  %v2062_v59 = vpop.f32.mrb[5].mxu1 }
 0x230   :  { %v361_v60 = vmul.f32 %v360_v58, %v2594_v55  ;;  %v328_v61 = vmul.f32 %v327_v57, %v2596_v56 }
 0x232   :  { %v362_v62 = vsel %vm47_vm0, %v361_v60, 0.0  ;;  %v329_v63 = vsel %vm47_vm0, %v328_v61, 0.0 }
 0x233   :  { %363 = vadd.xlane.f32.xlu1 %v362_v62  ;;  %330 = vadd.xlane.f32.xlu0 %v329_v63 }
 0x2c0   :  { %v364_v12 = vpop.xlane.xlu1 %363  ;;  %v331_v14 = vpop.xlane.xlu0 %330 }
 0x2c1   :  { %v365_v15 = vrot.slane %v364_v12, 4  ;;  %v332_v16 = vrot.slane %v331_v14, 4 }
 0x2c3   :  { %v366_v20 = vmax.f32 %v364_v12, %v365_v15  ;;  %v333_v21 = vmax.f32 %v331_v14, %v332_v16  ;;  %v1837_v15 = vld [vmem:[%s2991_s0 + $0x20] sm:$0xff]  ;;  %v1838_v16 = vld [vmem:[%s2991_s0 + $0x28] sm:$0xff] }
 0x2c4   :  { %2082 = vmatprep.mubr.msk.f32.mxu0 %vm47_vm0, %v1837_v15 }
 0x2c5   :  { %v367_v22 = vrot.slane %v366_v20, 2  ;;  %v334_v23 = vrot.slane %v333_v21, 2  ;;  %2083 = vmatmul.mubr.msk.f32.vlgmr.msra.gmra.mrb[0].mxu0 %vm47_vm0, %v1838_v16 }
 0x2c6   :  { %2104 = vmatprep.mubr.msk.f32.mxu0 %vm2440_vm1, %v2441_v17 }
 0x2c7   :  { %v368_v24 = vmax.f32 %v366_v20, %v367_v22  ;;  %v335_v25 = vmax.f32 %v333_v21, %v334_v23  ;;  %v1862_v20 = vld [vmem:[%s2997_s6 + $0x20] sm:$0xff]  ;;  %v1864_v22 = vld [vmem:[%s2997_s6 + $0x30] sm:$0xff]  ;;  %v1865_v23 = vld [vmem:[%s2997_s6 + $0x38] sm:$0xff] }
 0x2c9   :  { %v369_v26 = vrot.slane %v368_v24, 1  ;;  %v336_v27 = vrot.slane %v335_v25, 1 }
 0x2cb   :  { %v370_v28 = vmax.f32 %v368_v24, %v369_v26  ;;  %v337_v29 = vmax.f32 %v335_v25, %v336_v27  ;;  %v2285_v24 = vpack.c.bf16 %v1865_v23, %v1864_v22  ;;  %v1860_v27 = vld [vmem:[%s2996_s5 + $0x1] ss:$0 sm:$0xff] }
 0x2cd   :  { %v371_v30 = vsub.f32 %v364_v12, %v370_v28  ;;  %v338_v31 = vsub.f32 %v331_v14, %v337_v29  ;;  %v2279_v14 = vpack.c.bf16 %v1858_v11, %v1857_v10 }
 0x2cf   :  { %v372_v32 = vmul.f32 1.442695, %v371_v30  ;;  %v339_v33 = vmul.f32 1.442695, %v338_v31 }
 0x2d1   :  { %2378 = vpow2.f32 %v372_v32 }
 0x2d2   :  { %2380 = vpow2.f32 %v339_v33  ;;  %v1852_v33 = vld [vmem:[%s2994_s3 + $0x1] ss:$0 sm:$0xff] }
 0x2db   :  { %v2379_v34 = vpop.eup %2378 }
 0x2dc   :  { %v2381_v35 = vpop.eup %2380  ;;  %v374_v36 = vrot.slane %v2379_v34, 4 }
 0x2dd   :  { %v341_v37 = vrot.slane %v2381_v35, 4 }
 0x2de   :  { %v375_v38 = vadd.f32 %v2379_v34, %v374_v36 }
 0x2df   :  { %v342_v40 = vadd.f32 %v2381_v35, %v341_v37 }
 0x2e0   :  { %v376_v41 = vrot.slane %v375_v38, 2 }
 0x2e1   :  { %v343_v42 = vrot.slane %v342_v40, 2 }
 0x2e2   :  { %v377_v43 = vadd.f32 %v376_v41, %v375_v38 }
 0x2e3   :  { %v344_v44 = vadd.f32 %v343_v42, %v342_v40 }
 0x2e4   :  { %v378_v45 = vrot.slane %v377_v43, 1 }
 0x2e5   :  { %v345_v46 = vrot.slane %v344_v44, 1 }
 0x2e6   :  { %v379_v47 = vadd.f32 %v378_v45, %v377_v43  ;;  %v1867_v45 = vld [vmem:[%s2998_s7 + $0x20] sm:$0xff] }
 0x2e7   :  { %v346_v48 = vadd.f32 %v345_v46, %v344_v44  ;;  %v1868_v46 = vld [vmem:[%s2998_s7 + $0x28] sm:$0xff] }
 0x2e8   :  { %2382 = vrcp.f32 %v379_v47  ;;  %v1869_v47 = vld [vmem:[%s2998_s7 + $0x30] sm:$0xff] }
 0x2e9   :  { %2384 = vrcp.f32 %v346_v48  ;;  %v2288_v48 = vpack.c.bf16 %v1868_v46, %v1867_v45 }
 0x2f2   :  { %v2383_v49 = vpop.eup %2382 }
 0x2f3   :  { %v2385_v50 = vpop.eup %2384  ;;  %v381_v53 = vmul.f32 %v2383_v49, %v2379_v34  ;;  %v1870_v49 = vld [vmem:[%s2998_s7 + $0x38] sm:$0xff] }
 0x2f4   :  { %v348_v54 = vmul.f32 %v2385_v50, %v2381_v35  ;;  %v2291_v50 = vpack.c.bf16 %v1870_v49, %v1869_v47 }
 0x2f5   :  { %v382_v57 = vmul.f32 %v381_v53, %v2594_v55  ;;  %v1856_v55 = vld [vmem:[%s2995_s4 + $0x28] sm:$0xff]  ;;  %v1874_v53 = vld [vmem:[%s2993_s2 + $0x40] sm:$0xff] }
 0x2f6   :  { %v349_v58 = vmul.f32 %v348_v54, %v2596_v56  ;;  %v2276_v9 = vpack.c.bf16 %v1856_v55, %v1855_v6  ;;  %v1875_v54 = vld [vmem:[%s2993_s2 + $0x48] sm:$0xff] }
 0x2f7   :  { %v383_v59 = vsel %vm47_vm0, %v382_v57, 0.0  ;;  %v1876_v57 = vld [vmem:[%s2993_s2 + $0x50] sm:$0xff] }
 0x2f8   :  { %v350_v60 = vsel %vm47_vm0, %v349_v58, 0.0  ;;  %v384_v61 = vrot.slane %v383_v59, 4  ;;  %v2293_v58 = vpack.c.bf16 %v1875_v54, %v1874_v53  ;;  %v1883_v53 = vld [vmem:[%s2995_s4 + $0x48] sm:$0xff] }
 0x2f9   :  { %v351_v62 = vrot.slane %v350_v60, 4 }
 0x2fa   :  { %v385_v63 = vadd.f32 %v384_v61, %v383_v59  ;;  %v1877_v59 = vld [vmem:[%s2993_s2 + $0x58] sm:$0xff] }
 0x2fb   :  { %v352_v0 = vadd.f32 %v351_v62, %v350_v60  ;;  %v2297_v60 = vpack.c.bf16 %v1877_v59, %v1876_v57  ;;  %v1884_v59 = vld [vmem:[%s2995_s4 + $0x50] sm:$0xff] }
 0x2fc   :  { %v386_v1 = vrot.slane %v385_v63, 2 }
 0x2fd   :  { %v353_v2 = vrot.slane %v352_v0, 2 }
 0x2fe   :  { %v387_v3 = vadd.f32 %v386_v1, %v385_v63 }
 0x2ff   :  { %v354_v4 = vadd.f32 %v353_v2, %v352_v0 }
 0x300   :  { %v388_v5 = vrot.slane %v387_v3, 1 }
 0x301   :  { %v355_v56 = vrot.slane %v354_v4, 1 }
 0x302   :  { %v389_v7 = vadd.f32 %v388_v5, %v387_v3 }
 0x303   :  { %v356_v8 = vadd.f32 %v355_v56, %v354_v4 }
 0x305   :  { %v390_v12 = vsel %vm62_vm2, %v356_v8, %v389_v7 }
 0x306   :  { %2072 = vmatmul.mubr.msk.f32.vlgmr.msra.gmra.mrb[6].mxu1 %vm47_vm0, %v390_v12 }
 0x307   :  { %2277 = vmatpush3.bf16.msra.mxu1 %v2276_v9  ;;  %2093 = vmatprep.mubr.msk.f32.mxu1 %vm2440_vm1, %v2441_v17 }
 0x308   :  { %2278 = vmatprep.subr.bf16.mxu1 %v2439_v13 }
 0x30b   :  { %2280 = vmatpush3.bf16.msra.mxu1 %v2279_v14 }
 0x30c   :  { %2287 = vmatprep.subr.bf16.mxu1 %v2439_v13 }
 0x30e   :  { %2094 = vmatmul.mubr.msk.f32.vlgmr.msra.gmra.mrb[8].mxu1 %vm47_vm0, %v2567_v39  ;;  %v1863_v39 = vld [vmem:[%s2997_s6 + $0x28] sm:$0xff] }
 0x30f   :  { %2115 = vmatprep.mubr.msk.f32.mxu1 %vm2440_vm1, %v2441_v17  ;;  %v2282_v21 = vpack.c.bf16 %v1863_v39, %v1862_v20  ;;  %2289 = vmatpush3.bf16.msra.mxu1 %v2288_v48 }
 0x310   :  { %2290 = vmatprep.subr.bf16.mxu1 %v2439_v13 }
 0x311   :  { %2283 = vmatpush3.bf16.msra.mxu0 %v2282_v21 }
 0x312   :  { %2284 = vmatprep.subr.bf16.mxu0 %v2439_v13 }
 0x313   :  { %2292 = vmatpush3.bf16.msra.mxu1 %v2291_v50 }
 0x314   :  { %2301 = vmatprep.subr.bf16.mxu1 %v2439_v13 }
 0x315   :  { %2286 = vmatpush3.bf16.msra.mxu0 %v2285_v24 }
 0x316   :  { %2294 = vmatprep.subr.bf16.mxu0 %v2293_v58 }
 0x398   :  { %v2084_v31 = vpop.f32.mrb[0].mxu0 }
 0x399   :  { %v560_v32 = vpop.f32.mrb[1].mxu0  ;;  %v2695_v40 = vadd.f32 %v2084_v31, %v1852_v33 }
 0x39a   :  { %v2691_v35 = vadd.f32 %v1852_v33, %v560_v32 }
 0x3d9   :  { %v2680_v25 = vpop.f32.mrb[6].mxu1 }
 0x3da   :  { %v2073_v26 = vpop.f32.mrb[7].mxu1 }
 0x3e1   :  { %v648_v28 = vpop.f32.mrb[8].mxu1 }
 0x3e2   :  { %v649_v29 = vadd.f32 %v1860_v27, %v648_v28  ;;  %v2095_v30 = vpop.f32.mrb[9].mxu1 }
 0x3e4   :  { %2105 = vmatmul.mubr.msk.f32.vlgmr.msra.gmra.mrb[2].mxu0 %vm47_vm0, %v649_v29 }
 0x3e5   :  { %2126 = vmatprep.mubr.msk.f32.mxu0 %vm47_vm0, %v2549_v18  ;;  %2296 = vmatpush3.bf16.msra.mxu0 %v2293_v58 }
 0x3e6   :  { %2298 = vmatprep.subr.bf16.mxu0 %v2297_v60 }
 0x3e9   :  { %2300 = vmatpush3.bf16.msra.mxu0 %v2297_v60  ;;  %v1885_v60 = vld [vmem:[%s2995_s4 + $0x58] sm:$0xff] }
 0x3ea   :  { %2307 = vmatprep.subr.bf16.mxu0 %v2439_v13 }
 0x3ec   :  { %2127 = vmatmul.mubr.msk.f32.vlgmr.msra.gmra.mrb[4].mxu0 %vm47_vm0, %v2554_v19 }
 0x3ed   :  { %2148 = vmatprep.mubr.msk.f32.mxu0 %vm2440_vm1, %v2441_v17 }
 0x4b7   :  { %v726_v34 = vpop.f32.mrb[2].mxu0 }
 0x4b8   :  { %v733_v36 = vrot.slane %v726_v34, %v2587_v51  ;;  %v766_v37 = vrot.slane %v726_v34, %v2589_v52  ;;  %v2106_v38 = vpop.f32.mrb[3].mxu0 }
 0x4ba   :  { %v734_v41 = vmul.f32 %v733_v36, %v2691_v35  ;;  %v767_v43 = vmul.f32 %v766_v37, %v2695_v40 }
 0x4bc   :  { %v735_v42 = vsel %vm47_vm0, %v734_v41, 0.0  ;;  %v768_v44 = vsel %vm47_vm0, %v767_v43, 0.0 }
 0x4bd   :  { %736 = vadd.xlane.f32.xlu1 %v735_v42 }
 0x4c1   :  { %769 = vadd.xlane.f32.xlu1 %v768_v44 }
 0x54a   :  { %v737_v61 = vpop.xlane.xlu1 %736 }
 0x54b   :  { %v738_v62 = vrot.slane %v737_v61, 4 }
 0x54d   :  { %v739_v63 = vmax.f32 %v737_v61, %v738_v62  ;;  %v2305_v62 = vpack.c.bf16 %v1885_v60, %v1884_v59 }
 0x54e   :  { %v770_v0 = vpop.xlane.xlu1 %769 }
 0x54f   :  { %v740_v1 = vrot.slane %v739_v63, 2  ;;  %v771_v2 = vrot.slane %v770_v0, 4 }
 0x551   :  { %v741_v3 = vmax.f32 %v739_v63, %v740_v1  ;;  %v772_v4 = vmax.f32 %v770_v0, %v771_v2  ;;  %v1845_v63 = vld [vmem:[%s2999_s8] ss:$0 sm:$0xff]  ;;  %v1890_v2 = vld [vmem:[%s2997_s6 + $0x48] sm:$0xff] }
 0x552   :  { %v1889_v1 = vld [vmem:[%s2997_s6 + $0x40] sm:$0xff] }
 0x553   :  { %v742_v5 = vrot.slane %v741_v3, 1  ;;  %v773_v6 = vrot.slane %v772_v4, 2 }
 0x555   :  { %v743_v55 = vmax.f32 %v741_v3, %v742_v5  ;;  %v774_v56 = vmax.f32 %v772_v4, %v773_v6  ;;  %v2308_v3 = vpack.c.bf16 %v1890_v2, %v1889_v1  ;;  %v1892_v4 = vld [vmem:[%s2997_s6 + $0x58] sm:$0xff]  ;;  %v2128_v6 = vpop.f32.mrb[4].mxu0 }
 0x557   :  { %v744_v7 = vsub.f32 %v737_v61, %v743_v55  ;;  %v775_v8 = vrot.slane %v774_v56, 1  ;;  %2309 = vmatpush3.bf16.msra.mxu0 %v2308_v3  ;;  %v968_v55 = vpop.f32.mrb[5].mxu0 }
 0x558   :  { %2310 = vmatprep.subr.bf16.mxu0 %v2439_v13 }
 0x559   :  { %v745_v9 = vmul.f32 1.442695, %v744_v7  ;;  %v776_v10 = vmax.f32 %v774_v56, %v775_v8  ;;  %v1887_v8 = vld [vmem:[%s2996_s5 + $0x2] ss:$0 sm:$0xff] }
 0x55b   :  { %2386 = vpow2.f32 %v745_v9  ;;  %v777_v11 = vsub.f32 %v770_v0, %v776_v10  ;;  %v2757_v0 = vadd.f32 %v1845_v63, %v2680_v25  ;;  %v1891_v25 = vld [vmem:[%s2997_s6 + $0x50] sm:$0xff] }
 0x55c   :  { %v2311_v5 = vpack.c.bf16 %v1892_v4, %v1891_v25 }
 0x55d   :  { %v778_v12 = vmul.f32 1.442695, %v777_v11 }
 0x55e   :  { %2312 = vmatpush3.bf16.msra.mxu0 %v2311_v5 }
 0x55f   :  { %2388 = vpow2.f32 %v778_v12  ;;  %v1879_v12 = vld [vmem:[%s2994_s3 + $0x2] ss:$0 sm:$0xff] }
 0x565   :  { %v2387_v14 = vpop.eup %2386 }
 0x566   :  { %v747_v15 = vrot.slane %v2387_v14, 4 }
 0x568   :  { %v748_v16 = vadd.f32 %v2387_v14, %v747_v15  ;;  %v2788_v15 = vadd.f32 %v1879_v12, %v968_v55 }
 0x569   :  { %v2389_v20 = vpop.eup %2388 }
 0x56a   :  { %v749_v39 = vrot.slane %v748_v16, 2  ;;  %v780_v21 = vrot.slane %v2389_v20, 4 }
 0x56c   :  { %v750_v22 = vadd.f32 %v749_v39, %v748_v16  ;;  %v781_v23 = vadd.f32 %v2389_v20, %v780_v21  ;;  %v2792_v21 = vadd.f32 %v2128_v6, %v1879_v12 }
 0x56e   :  { %v782_v24 = vrot.slane %v781_v23, 2  ;;  %v751_v26 = vrot.slane %v750_v22, 1 }
 0x570   :  { %v783_v27 = vadd.f32 %v782_v24, %v781_v23  ;;  %v752_v28 = vadd.f32 %v751_v26, %v750_v22  ;;  %v1894_v26 = vld [vmem:[%s2998_s7 + $0x40] sm:$0xff] }
 0x572   :  { %2390 = vrcp.f32 %v752_v28  ;;  %v784_v29 = vrot.slane %v783_v27, 1  ;;  %v1896_v28 = vld [vmem:[%s2998_s7 + $0x50] sm:$0xff] }
 0x574   :  { %v785_v30 = vadd.f32 %v784_v29, %v783_v27  ;;  %v1895_v27 = vld [vmem:[%s2998_s7 + $0x48] sm:$0xff] }
 0x575   :  { %v2314_v29 = vpack.c.bf16 %v1895_v27, %v1894_v26 }
 0x576   :  { %2392 = vrcp.f32 %v785_v30  ;;  %v1897_v30 = vld [vmem:[%s2998_s7 + $0x58] sm:$0xff] }
 0x57c   :  { %v2391_v31 = vpop.eup %2390 }
 0x57d   :  { %v754_v32 = vmul.f32 %v2391_v31, %v2387_v14  ;;  %v2317_v31 = vpack.c.bf16 %v1897_v30, %v1896_v28 }
 0x57f   :  { %v755_v33 = vmul.f32 %v754_v32, %v2691_v35  ;;  %v1882_v35 = vld [vmem:[%s2995_s4 + $0x40] sm:$0xff] }
 0x580   :  { %v2393_v34 = vpop.eup %2392  ;;  %v2302_v58 = vpack.c.bf16 %v1883_v53, %v1882_v35  ;;  %v1901_v32 = vld [vmem:[%s2993_s2 + $0x60] sm:$0xff] }
 0x581   :  { %v756_v36 = vsel %vm47_vm0, %v755_v33, 0.0  ;;  %v787_v37 = vmul.f32 %v2393_v34, %v2389_v20  ;;  %v1902_v33 = vld [vmem:[%s2993_s2 + $0x68] sm:$0xff]  ;;  %v1903_v34 = vld [vmem:[%s2993_s2 + $0x70] sm:$0xff] }
 0x582   :  { %v757_v38 = vrot.slane %v756_v36, 4 }
 0x583   :  { %v788_v41 = vmul.f32 %v787_v37, %v2695_v40  ;;  %v1904_v37 = vld [vmem:[%s2993_s2 + $0x78] sm:$0xff] }
 0x584   :  { %v758_v42 = vadd.f32 %v757_v38, %v756_v36  ;;  %v2319_v36 = vpack.c.bf16 %v1902_v33, %v1901_v32  ;;  %v2323_v38 = vpack.c.bf16 %v1904_v37, %v1903_v34  ;;  %v1912_v37 = vld [vmem:[%s2995_s4 + $0x78] sm:$0xff] }
 0x585   :  { %v789_v43 = vsel %vm47_vm0, %v788_v41, 0.0 }
 0x586   :  { %v759_v44 = vrot.slane %v758_v42, 2  ;;  %v790_v45 = vrot.slane %v789_v43, 4  ;;  %2320 = vmatprep.subr.bf16.mxu0 %v2319_v36 }
 0x588   :  { %v760_v46 = vadd.f32 %v759_v44, %v758_v42  ;;  %v791_v47 = vadd.f32 %v790_v45, %v789_v43 }
 0x58a   :  { %v792_v48 = vrot.slane %v791_v47, 2  ;;  %v761_v49 = vrot.slane %v760_v46, 1 }
 0x58c   :  { %v793_v50 = vadd.f32 %v792_v48, %v791_v47  ;;  %v762_v40 = vadd.f32 %v761_v49, %v760_v46 }
 0x58e   :  { %v794_v54 = vrot.slane %v793_v50, 1 }
 0x590   :  { %v795_v57 = vadd.f32 %v794_v54, %v793_v50 }
 0x592   :  { %v796_v61 = vsel %vm62_vm2, %v762_v40, %v795_v57 }
 0x593   :  { %2116 = vmatmul.mubr.msk.f32.vlgmr.msra.gmra.mrb[10].mxu1 %vm47_vm0, %v796_v61 }
 0x594   :  { %2303 = vmatpush3.bf16.msra.mxu1 %v2302_v58  ;;  %2137 = vmatprep.mubr.msk.f32.mxu1 %vm2440_vm1, %v2441_v17 }
 0x595   :  { %2304 = vmatprep.subr.bf16.mxu1 %v2439_v13 }
 0x598   :  { %2306 = vmatpush3.bf16.msra.mxu1 %v2305_v62 }
 0x599   :  { %2313 = vmatprep.subr.bf16.mxu1 %v2439_v13 }
 0x59b   :  { %2138 = vmatmul.mubr.msk.f32.vlgmr.msra.gmra.mrb[12].mxu1 %vm47_vm0, %v2757_v0 }
 0x59c   :  { %2159 = vmatprep.mubr.msk.f32.mxu1 %vm2440_vm1, %v2441_v17  ;;  %2315 = vmatpush3.bf16.msra.mxu1 %v2314_v29 }
 0x59d   :  { %2316 = vmatprep.subr.bf16.mxu1 %v2439_v13 }
 0x5a0   :  { %2318 = vmatpush3.bf16.msra.mxu1 %v2317_v31  ;;  %v1910_v31 = vld [vmem:[%s2995_s4 + $0x68] sm:$0xff] }
 0x5a1   :  { %2327 = vmatprep.subr.bf16.mxu1 %v2439_v13 }
 0x666   :  { %v2777_v56 = vpop.f32.mrb[10].mxu1 }
 0x667   :  { %v2117_v7 = vpop.f32.mrb[11].mxu1 }
 0x66e   :  { %v1059_v9 = vpop.f32.mrb[12].mxu1 }
 0x66f   :  { %v1060_v10 = vadd.f32 %v1887_v8, %v1059_v9  ;;  %v2139_v11 = vpop.f32.mrb[13].mxu1 }
 0x671   :  { %2149 = vmatmul.mubr.msk.f32.vlgmr.msra.gmra.mrb[6].mxu0 %vm47_vm0, %v1060_v10 }
 0x672   :  { %2170 = vmatprep.mubr.msk.f32.mxu0 %vm47_vm0, %v2549_v18  ;;  %2322 = vmatpush3.bf16.msra.mxu0 %v2319_v36  ;;  %v1911_v36 = vld [vmem:[%s2995_s4 + $0x70] sm:$0xff] }
 0x673   :  { %2324 = vmatprep.subr.bf16.mxu0 %v2323_v38 }
 0x676   :  { %2326 = vmatpush3.bf16.msra.mxu0 %v2323_v38 }
 0x677   :  { %2333 = vmatprep.subr.bf16.mxu0 %v2439_v13 }
 0x679   :  { %2171 = vmatmul.mubr.msk.f32.vlgmr.msra.gmra.mrb[8].mxu0 %vm47_vm0, %v2554_v19 }
 0x67a   :  { %2192 = vmatprep.mubr.msk.f32.mxu0 %vm2440_vm1, %v2441_v17 }
 0x744   :  { %v1137_v14 = vpop.f32.mrb[6].mxu0 }
 0x745   :  { %v1144_v16 = vrot.slane %v1137_v14, %v2587_v51  ;;  %v1177_v20 = vrot.slane %v1137_v14, %v2589_v52  ;;  %v2150_v39 = vpop.f32.mrb[7].mxu0 }
 0x747   :  { %v1145_v22 = vmul.f32 %v1144_v16, %v2788_v15  ;;  %v1178_v18 = vmul.f32 %v1177_v20, %v2792_v21 }
 0x749   :  { %v1146_v23 = vsel %vm47_vm0, %v1145_v22, 0.0  ;;  %v1179_v24 = vsel %vm47_vm0, %v1178_v18, 0.0 }
 0x74a   :  { %1147 = vadd.xlane.f32.xlu1 %v1146_v23 }
 0x74e   :  { %1180 = vadd.xlane.f32.xlu1 %v1179_v24 }
 0x7d7   :  { %v1148_v41 = vpop.xlane.xlu1 %1147 }
 0x7d8   :  { %v1149_v42 = vrot.slane %v1148_v41, 4 }
 0x7da   :  { %v1150_v43 = vmax.f32 %v1148_v41, %v1149_v42  ;;  %v1872_v42 = vld [vmem:[%s2999_s8 + $0x1] ss:$0 sm:$0xff] }
 0x7db   :  { %v1181_v44 = vpop.xlane.xlu1 %1180 }
 0x7dc   :  { %v1151_v45 = vrot.slane %v1150_v43, 2  ;;  %v1182_v46 = vrot.slane %v1181_v44, 4 }
 0x7de   :  { %v1152_v47 = vmax.f32 %v1150_v43, %v1151_v45  ;;  %v1183_v48 = vmax.f32 %v1181_v44, %v1182_v46  ;;  %v880_v43 = vadd.f32 %v1872_v42, %v2777_v56  ;;  %v1917_v45 = vld [vmem:[%s2997_s6 + $0x68] sm:$0xff]  ;;  %v1918_v56 = vld [vmem:[%s2997_s6 + $0x70] sm:$0xff] }
 0x7e0   :  { %v1153_v49 = vrot.slane %v1152_v47, 1  ;;  %v1184_v50 = vrot.slane %v1183_v48, 2 }
 0x7e2   :  { %v1154_v35 = vmax.f32 %v1152_v47, %v1153_v49  ;;  %v1185_v53 = vmax.f32 %v1183_v48, %v1184_v50  ;;  %v1919_v47 = vld [vmem:[%s2997_s6 + $0x78] sm:$0xff]  ;;  %v2172_v49 = vpop.f32.mrb[8].mxu0 }
 0x7e3   :  { %v2337_v48 = vpack.c.bf16 %v1919_v47, %v1918_v56  ;;  %v1373_v50 = vpop.f32.mrb[9].mxu0 }
 0x7e4   :  { %v1155_v54 = vsub.f32 %v1148_v41, %v1154_v35  ;;  %v1186_v40 = vrot.slane %v1185_v53, 1  ;;  %v2331_v41 = vpack.c.bf16 %v1912_v37, %v1911_v36 }
 0x7e6   :  { %v1156_v57 = vmul.f32 1.442695, %v1155_v54  ;;  %v1187_v58 = vmax.f32 %v1185_v53, %v1186_v40  ;;  %v1914_v54 = vld [vmem:[%s2996_s5 + $0x3] ss:$0 sm:$0xff] }
 0x7e8   :  { %2394 = vpow2.f32 %v1156_v57  ;;  %v1188_v19 = vsub.f32 %v1181_v44, %v1187_v58  ;;  %v1916_v44 = vld [vmem:[%s2997_s6 + $0x60] sm:$0xff] }
 0x7e9   :  { %v2334_v46 = vpack.c.bf16 %v1917_v45, %v1916_v44 }
 0x7ea   :  { %v1189_v59 = vmul.f32 1.442695, %v1188_v19  ;;  %v1906_v19 = vld [vmem:[%s2994_s3 + $0x3] ss:$0 sm:$0xff] }
 0x7eb   :  { %2335 = vmatpush3.bf16.msra.mxu0 %v2334_v46 }
 0x7ec   :  { %2396 = vpow2.f32 %v1189_v59  ;;  %2336 = vmatprep.subr.bf16.mxu0 %v2439_v13 }
 0x7ef   :  { %2338 = vmatpush3.bf16.msra.mxu0 %v2337_v48 }
 0x7f0   :  { %2345 = vmatprep.subr.bf16.mxu0 %v2439_v13 }
 0x7f2   :  { %v2395_v60 = vpop.eup %2394 }
 0x7f3   :  { %v1158_v61 = vrot.slane %v2395_v60, 4 }
 0x7f5   :  { %v1159_v62 = vadd.f32 %v2395_v60, %v1158_v61 }
 0x7f6   :  { %v2397_v63 = vpop.eup %2396 }
 0x7f7   :  { %v1160_v1 = vrot.slane %v1159_v62, 2  ;;  %v1191_v2 = vrot.slane %v2397_v63, 4 }
 0x7f9   :  { %v1161_v3 = vadd.f32 %v1160_v1, %v1159_v62  ;;  %v1192_v25 = vadd.f32 %v2397_v63, %v1191_v2  ;;  %v2885_v1 = vadd.f32 %v2172_v49, %v1906_v19 }
 0x7fb   :  { %v1193_v4 = vrot.slane %v1192_v25, 2  ;;  %v1162_v5 = vrot.slane %v1161_v3, 1 }
 0x7fd   :  { %v1194_v6 = vadd.f32 %v1193_v4, %v1192_v25  ;;  %v1163_v55 = vadd.f32 %v1162_v5, %v1161_v3  ;;  %v1899_v4 = vld [vmem:[%s2999_s8 + $0x2] ss:$0 sm:$0xff]  ;;  %v1922_v5 = vld [vmem:[%s2998_s7 + $0x68] sm:$0xff] }
 0x7ff   :  { %2398 = vrcp.f32 %v1163_v55  ;;  %v1195_v7 = vrot.slane %v1194_v6, 1 }
 0x801   :  { %v1196_v8 = vadd.f32 %v1195_v7, %v1194_v6  ;;  %v1923_v6 = vld [vmem:[%s2998_s7 + $0x70] sm:$0xff]  ;;  %v1924_v7 = vld [vmem:[%s2998_s7 + $0x78] sm:$0xff] }
 0x803   :  { %2400 = vrcp.f32 %v1196_v8  ;;  %v2343_v8 = vpack.c.bf16 %v1924_v7, %v1923_v6  ;;  %v1720_v7 = vld [vmem:[%s3000_s9 + $0x28] sm:$0xff] }
 0x809   :  { %v2399_v9 = vpop.eup %2398 }
 0x80a   :  { %v1165_v10 = vmul.f32 %v2399_v9, %v2395_v60  ;;  %v2881_v60 = vadd.f32 %v1906_v19, %v1373_v50 }
 0x80c   :  { %v1166_v11 = vmul.f32 %v1165_v10, %v2788_v15  ;;  %v1909_v15 = vld [vmem:[%s2995_s4 + $0x60] sm:$0xff] }
 0x80d   :  { %v2401_v12 = vpop.eup %2400  ;;  %v2328_v34 = vpack.c.bf16 %v1910_v31, %v1909_v15 }
 0x80e   :  { %v1167_v14 = vsel %vm47_vm0, %v1166_v11, 0.0  ;;  %v1198_v16 = vmul.f32 %v2401_v12, %v2397_v63 }
 0x80f   :  { %v1168_v20 = vrot.slane %v1167_v14, 4 }
 0x810   :  { %v1199_v39 = vmul.f32 %v1198_v16, %v2792_v21 }
 0x811   :  { %v1169_v22 = vadd.f32 %v1168_v20, %v1167_v14 }
 0x812   :  { %v1200_v23 = vsel %vm47_vm0, %v1199_v39, 0.0 }
 0x813   :  { %v1170_v18 = vrot.slane %v1169_v22, 2  ;;  %v1201_v24 = vrot.slane %v1200_v23, 4 }
 0x815   :  { %v1171_v26 = vadd.f32 %v1170_v18, %v1169_v22  ;;  %v1202_v27 = vadd.f32 %v1201_v24, %v1200_v23 }
 0x817   :  { %v1203_v28 = vrot.slane %v1202_v27, 2  ;;  %v1172_v29 = vrot.slane %v1171_v26, 1 }
 0x819   :  { %v1204_v30 = vadd.f32 %v1203_v28, %v1202_v27  ;;  %v1173_v21 = vadd.f32 %v1172_v29, %v1171_v26 }
 0x81b   :  { %v1205_v32 = vrot.slane %v1204_v30, 1 }
 0x81d   :  { %v1206_v33 = vadd.f32 %v1205_v32, %v1204_v30 }
 0x81f   :  { %v1207_v38 = vsel %vm62_vm2, %v1173_v21, %v1206_v33 }
 0x820   :  { %2160 = vmatmul.mubr.msk.f32.vlgmr.msra.gmra.mrb[14].mxu1 %vm47_vm0, %v1207_v38 }
 0x821   :  { %2329 = vmatpush3.bf16.msra.mxu1 %v2328_v34  ;;  %2181 = vmatprep.mubr.msk.f32.mxu1 %vm2440_vm1, %v2441_v17 }
 0x822   :  { %2330 = vmatprep.subr.bf16.mxu1 %v2439_v13 }
 0x825   :  { %2332 = vmatpush3.bf16.msra.mxu1 %v2331_v41 }
 0x826   :  { %2339 = vmatprep.subr.bf16.mxu1 %v2439_v13 }
 0x828   :  { %2182 = vmatmul.mubr.msk.f32.vlgmr.msra.gmra.mrb[16].mxu1 %vm47_vm0, %v880_v43 }
 0x829   :  { %2203 = vmatprep.mubr.msk.f32.mxu1 %vm2440_vm1, %v2441_v17 }
 0x8f3   :  { %v1290_v35 = vpop.f32.mrb[14].mxu1 }
 0x8f4   :  { %v2161_v53 = vpop.f32.mrb[15].mxu1 }
 0x8fb   :  { %v1464_v40 = vpop.f32.mrb[16].mxu1 }
 0x8fc   :  { %v1465_v57 = vadd.f32 %v1914_v54, %v1464_v40  ;;  %v2183_v58 = vpop.f32.mrb[17].mxu1 }
 0x8fe   :  { %2193 = vmatmul.mubr.msk.f32.vlgmr.msra.gmra.mrb[10].mxu0 %vm47_vm0, %v1465_v57 }
 0x8ff   :  { %2238 = vmatprep.mubr.msk.f32.mxu0 %vm2440_vm1, %v2441_v17 }
 0x9d1   :  { %v1542_v59 = vpop.f32.mrb[10].mxu0 }
 0x9d2   :  { %v1549_v61 = vrot.slane %v1542_v59, %v2587_v51  ;;  %v1582_v62 = vrot.slane %v1542_v59, %v2589_v52  ;;  %v2194_v63 = vpop.f32.mrb[11].mxu0  ;;  %v1291_v51 = vadd.f32 %v1899_v4, %v1290_v35  ;;  %v1921_v52 = vld [vmem:[%s2998_s7 + $0x60] sm:$0xff]  ;;  %v1716_v4 = vld [vmem:[%s3000_s9 + $0x8] sm:$0xff] }
 0x9d3   :  { %v2340_v55 = vpack.c.bf16 %v1922_v5, %v1921_v52  ;;  %v1718_v5 = vld [vmem:[%s3000_s9 + $0x18] sm:$0xff] }
 0x9d4   :  { %v1550_v2 = vmul.f32 %v1549_v61, %v2881_v60  ;;  %v1583_v17 = vmul.f32 %v1582_v62, %v2885_v1 }
 0x9d5   :  { %2341 = vmatpush3.bf16.msra.mxu1 %v2340_v55  ;;  %v1719_v55 = vld [vmem:[%s3000_s9 + $0x20] sm:$0xff] }
 0x9d6   :  { %v1551_v3 = vsel %vm47_vm0, %v1550_v2, 0.0  ;;  %v1584_v25 = vsel %vm47_vm0, %v1583_v17, 0.0  ;;  %2342 = vmatprep.subr.bf16.mxu1 %v2439_v13 }
 0x9d7   :  { %1552 = vadd.xlane.f32.xlu1 %v1551_v3 }
 0x9d9   :  { %2344 = vmatpush3.bf16.msra.mxu1 %v2343_v8  ;;  %v2352_v8 = vpack.c.bf16 %v1720_v7, %v1719_v55 }
 0x9db   :  { %1585 = vadd.xlane.f32.xlu1 %v1584_v25 }
 0x9ec   :  { %1700 = vrot.lane.b32.xlu1 %v1291_v51, %s2442_s24  ;;  %v1717_v51 = vld [vmem:[%s3000_s9 + $0x10] sm:$0xff] }
 0x9ed   :  { %v2349_v6 = vpack.c.bf16 %v1718_v5, %v1717_v51 }
 0x9f0   :  { %1707 = vrot.lane.b32.xlu1 %v880_v43, %s2443_s25 }
 0xa64   :  { %v1553_v9 = vpop.xlane.xlu1 %1552 }
 0xa65   :  { %v1554_v10 = vrot.slane %v1553_v9, 4 }
 0xa67   :  { %v1555_v11 = vmax.f32 %v1553_v9, %v1554_v10  ;;  %v1722_v10 = vld [vmem:[%s3000_s9 + $0x38] sm:$0xff] }
 0xa68   :  { %v1586_v12 = vpop.xlane.xlu1 %1585 }
 0xa69   :  { %v1556_v14 = vrot.slane %v1555_v11, 2  ;;  %v1587_v16 = vrot.slane %v1586_v12, 4 }
 0xa6b   :  { %v1557_v20 = vmax.f32 %v1555_v11, %v1556_v14  ;;  %v1588_v39 = vmax.f32 %v1586_v12, %v1587_v16  ;;  %v1724_v14 = vld [vmem:[%s3000_s9 + $0x48] sm:$0xff] }
 0xa6d   :  { %v1558_v22 = vrot.slane %v1557_v20, 1  ;;  %v1589_v23 = vrot.slane %v1588_v39, 2 }
 0xa6f   :  { %v1559_v18 = vmax.f32 %v1557_v20, %v1558_v22  ;;  %v1590_v24 = vmax.f32 %v1588_v39, %v1589_v23  ;;  %v1725_v20 = vld [vmem:[%s3000_s9 + $0x50] sm:$0xff]  ;;  %v1726_v39 = vld [vmem:[%s3000_s9 + $0x58] sm:$0xff]  ;;  %v1727_v23 = vld [vmem:[%s3000_s9 + $0x60] sm:$0xff] }
 0xa70   :  { %v2361_v22 = vpack.c.bf16 %v1726_v39, %v1725_v20 }
 0xa71   :  { %v1560_v26 = vsub.f32 %v1553_v9, %v1559_v18  ;;  %v1591_v27 = vrot.slane %v1590_v24, 1  ;;  %v1721_v9 = vld [vmem:[%s3000_s9 + $0x30] sm:$0xff]  ;;  %v1728_v18 = vld [vmem:[%s3000_s9 + $0x68] sm:$0xff] }
 0xa72   :  { %v2355_v11 = vpack.c.bf16 %v1722_v10, %v1721_v9 }
 0xa73   :  { %v1561_v28 = vmul.f32 1.442695, %v1560_v26  ;;  %v1592_v29 = vmax.f32 %v1590_v24, %v1591_v27  ;;  %v2364_v24 = vpack.c.bf16 %v1728_v18, %v1727_v23  ;;  %v1729_v26 = vld [vmem:[%s3000_s9 + $0x70] sm:$0xff]  ;;  %v1730_v27 = vld [vmem:[%s3000_s9 + $0x78] sm:$0xff] }
 0xa75   :  { %2402 = vpow2.f32 %v1561_v28  ;;  %v1593_v30 = vsub.f32 %v1586_v12, %v1592_v29  ;;  %v1723_v12 = vld [vmem:[%s3000_s9 + $0x40] sm:$0xff]  ;;  %v2367_v28 = vpack.c.bf16 %v1730_v27, %v1729_v26 }
 0xa76   :  { %v2358_v16 = vpack.c.bf16 %v1724_v14, %v1723_v12  ;;  %v1926_v29 = vld [vmem:[%s2999_s8 + $0x3] ss:$0 sm:$0xff]  ;;  %s2445_s8 = smov [#allocation2]  }
 0xa77   :  { %v1594_v15 = vmul.f32 1.442695, %v1593_v30  ;;  %s1827_s19 = sshll.u32 %s2445_s8, 4  ;;  %s1828_s19 = int_to_ptr.vmem [resolvable:$true] %s1827_s19 }
 0xa78   :  { %p2419_p1 = scmp.lt.s32.totalorder %s1828_s19, %s1828_s19 }
 0xa79   :  { %2404 = vpow2.f32 %v1594_v15 }
 0xa7f   :  { %v2403_v31 = vpop.eup %2402 }
 0xa80   :  { %v1563_v32 = vrot.slane %v2403_v31, 4 }
 0xa82   :  { %v1564_v21 = vadd.f32 %v2403_v31, %v1563_v32  ;;  %v1701_v32 = vpop.permute.xlu1 %1700 }
 0xa83   :  { %v2405_v33 = vpop.eup %2404 }
 0xa84   :  { %v1565_v34 = vrot.slane %v1564_v21, 2  ;;  %v1596_v36 = vrot.slane %v2405_v33, 4 }
 0xa86   :  { %v1566_v37 = vadd.f32 %v1565_v34, %v1564_v21  ;;  %v1597_v38 = vadd.f32 %v2405_v33, %v1596_v36  ;;  %v1710_v21 = vsel %vm47_vm0, %v2757_v0, %v1701_v32  ;;  %v1708_v34 = vpop.permute.xlu1 %1707 }
 0xa88   :  { %v1598_v41 = vrot.slane %v1597_v38, 2  ;;  %v1567_v42 = vrot.slane %v1566_v37, 1 }
 0xa8a   :  { %v1599_v43 = vadd.f32 %v1598_v41, %v1597_v38  ;;  %v1568_v44 = vadd.f32 %v1567_v42, %v1566_v37  ;;  %v1928_v37 = vld [vmem:[%s3001_s10] ss:$0 sm:$0xff]  ;;  %s2414_s10 = scalar_lea.vmem %s1828_s19, 32 }
 0xa8b   :  { %p2415_p0 = scmp.ne.s32.totalorder %s1828_s19, %s2414_s10  ;;  %p2420_p2 = scmp.lt.s32.totalorder %s2414_s10, %s2414_s10 }
 0xa8c   :  { %2406 = vrcp.f32 %v1568_v44  ;;  %v1600_v45 = vrot.slane %v1599_v43, 1 }
 0xa8d   :  { %p2421_p3 = por %p2420_p2, %p2419_p1 }
 0xa8e   :  { %v1601_v46 = vadd.f32 %v1600_v45, %v1599_v43 }
 0xa8f   :  { %p2422_p4 = pnand %p2421_p3, %p2415_p0 }
 0xa90   :  { %2408 = vrcp.f32 %v1601_v46 }
 0xa96   :  { %v2407_v56 = vpop.eup %2406 }
 0xa97   :  { %v1570_v47 = vmul.f32 %v2407_v56, %v2403_v31 }
 0xa99   :  { %v1571_v48 = vmul.f32 %v1570_v47, %v2881_v60 }
 0xa9a   :  { %v2409_v49 = vpop.eup %2408 }
 0xa9b   :  { %v1572_v50 = vsel %vm47_vm0, %v1571_v48, 0.0  ;;  %v1603_v35 = vmul.f32 %v2409_v49, %v2405_v33 }
 0xa9c   :  { %v1573_v53 = vrot.slane %v1572_v50, 4 }
 0xa9d   :  { %v1604_v54 = vmul.f32 %v1603_v35, %v2885_v1  ;;  %v1715_v1 = vld [vmem:[%s3000_s9] sm:$0xff] }
 0xa9e   :  { %v1574_v40 = vadd.f32 %v1573_v53, %v1572_v50  ;;  %v2346_v52 = vpack.c.bf16 %v1716_v4, %v1715_v1 }
 0xa9f   :  { %v1605_v57 = vsel %vm47_vm0, %v1604_v54, 0.0 }
 0xaa0   :  { %v1575_v58 = vrot.slane %v1574_v40, 2  ;;  %v1606_v19 = vrot.slane %v1605_v57, 4  ;;  %2347 = vmatpush3.bf16.msra.mxu0 %v2346_v52 }
 0xaa1   :  { %2348 = vmatprep.subr.bf16.mxu0 %v2439_v13 }
 0xaa2   :  { %v1576_v59 = vadd.f32 %v1575_v58, %v1574_v40  ;;  %v1607_v61 = vadd.f32 %v1606_v19, %v1605_v57 }
 0xaa4   :  { %v1608_v62 = vrot.slane %v1607_v61, 2  ;;  %v1577_v63 = vrot.slane %v1576_v59, 1  ;;  %2350 = vmatpush3.bf16.msra.mxu0 %v2349_v6 }
 0xaa5   :  { %2351 = vmatprep.subr.bf16.mxu0 %v2439_v13 }
 0xaa6   :  { %v1609_v2 = vadd.f32 %v1608_v62, %v1607_v61  ;;  %v1578_v17 = vadd.f32 %v1577_v63, %v1576_v59 }
 0xaa8   :  { %v1610_v3 = vrot.slane %v1609_v2, 1  ;;  %2353 = vmatpush3.bf16.msra.mxu0 %v2352_v8 }
 0xaa9   :  { %2354 = vmatprep.subr.bf16.mxu0 %v2439_v13 }
 0xaaa   :  { %v1611_v60 = vadd.f32 %v1610_v3, %v1609_v2 }
 0xaac   :  { %v1612_v25 = vsel %vm62_vm2, %v1578_v17, %v1611_v60  ;;  %2356 = vmatpush3.bf16.msra.mxu0 %v2355_v11 }
 0xaad   :  { %2204 = vmatmul.mubr.msk.f32.vlgmr.msra.gmra.mrb[18].mxu1 %vm47_vm0, %v1612_v25  ;;  %2357 = vmatprep.subr.bf16.mxu0 %v2439_v13 }
 0xab0   :  { %2359 = vmatpush3.bf16.msra.mxu0 %v2358_v16 }
 0xab1   :  { %2360 = vmatprep.subr.bf16.mxu0 %v2439_v13 }
 0xab4   :  { %2362 = vmatpush3.bf16.msra.mxu0 %v2361_v22 }
 0xab5   :  { %2363 = vmatprep.subr.bf16.mxu0 %v2439_v13 }
 0xab8   :  { %2365 = vmatpush3.bf16.msra.mxu0 %v2364_v24 }
 0xab9   :  { %2366 = vmatprep.subr.bf16.mxu0 %v2439_v13 }
 0xabc   :  { %2368 = vmatpush3.bf16.msra.mxu0 %v2367_v28 }
 0xb80   :  { %v1695_v30 = vpop.f32.mrb[18].mxu1 }
 0xb81   :  { %v1696_v15 = vadd.f32 %v1926_v29, %v1695_v30  ;;  %v2205_v31 = vpop.f32.mrb[19].mxu1 }
 0xb83   :  { %1704 = vrot.lane.b32.xlu0 %v1696_v15, %s2444_s17 }
 0xbf5   :  { %v1705_v33 = vpop.permute.xlu0 %1704 }
 0xbf6   :  { %v1712_v36 = vsel %vm1711_vm3, %v1710_v21, %v1705_v33 }
 0xbf7   :  { %v1714_v13 = vsel %vm1713_vm4, %v1712_v36, %v1708_v34 }
 0xbf8   :  { %2239 = vmatmul.mubr.f32.vlgmr.msra.gmra.mrb[12].mxu0 %v1714_v13 }
 0xccb   :  { %v1804_v38 = vpop.f32.mrb[12].mxu0 }
 0xccc   :  { %v1805_v41 = vadd.f32 %v1928_v37, %v1804_v38  ;;  %v2240_v42 = vpop.f32.mrb[13].mxu0 }
 0xcce   :  { %v1809_v43 = vsel %vm1808_vm5, %v1805_v41, -inf }
 0xccf   :  { %1810 = vmax.xlane.f32.xlu1 %v1809_v43 }
 0xd5c   :  { %v1811_v44 = vpop.xlane.xlu1 %1810 }
 0xd5d   :  { %v1812_v45 = vsub.f32 %v1805_v41, %v1811_v44 }
 0xd5f   :  { %v1813_v46 = vmul.f32 1.442695, %v1812_v45 }
 0xd61   :  { %2410 = vpow2.f32 %v1813_v46 }
 0xd6b   :  { %v2411_v0 = vpop.eup %2410 }
 0xd6c   :  { %v1815_v56 = vsel %vm1808_vm5, %v2411_v0, 0.0 }
 0xd6d   :  { %1816 = vadd.xlane.f32.xlu0 %v1815_v56 }
 0xdfa   :  { %v1817_v47 = vpop.xlane.xlu0 %1816 }
 0xdfb   :  { %2412 = vrcp.f32 %v1817_v47 }
 0xe05   :  { %v2413_v48 = vpop.eup %2412 }
 0xe06   :  { %v1819_v49 = vmul.f32 %v2413_v48, %v2411_v0 }
 0xe08   :  { %1820 = vst.msk [vmem:[#allocation2] sm:$0x3] %vm1808_vm5, %v1819_v49 }
 0xe09   :  { %2425 = shalt.err (!%p2422_p4)
}
 0xe0a   :  { %s2426_s22 = scalar_lea.hbm %s3002_s11, 32 }
 0xe0b   :  { %p2427_p5 = scmp.ne.s32.totalorder %s3002_s11, %s2426_s22  ;;  %p2430_p6 = scmp.lt.u32.totalorder %s2426_s22, %s3002_s11 }
 0xe0d   :  { %p2432_p7 = pnand %p2430_p6, %p2427_p5 }
 0xe0f   :  { %2435 = shalt.err (!%p2432_p7)
}
 0xe10   :  { %1830 = dma.vmem_to_hbm [thread:$0]  %s1828_s19, 32, %s3002_s11, [#allocation3]  }
 0xe11   :  { %2436 = dma.done.wait [#allocation3], 32  }
 0xe12   :  { %2437 = vsyncadd [#allocation3], 4294967264 }
 0xe13   :  { %1834 = vsyncpa [#allocation3], 1 }

</bundles_post_ra>
